<compile_context>
chip_gen: v6e
topology: v6e:2x2x1
jax: 0.10.0
libtpu: 0.0.40
codegen_flags: <defaults>
</compile_context>

<pallas_src>
import functools

import jax
import jax.numpy as jnp
from jax.experimental import pallas as pl
from jax.experimental.pallas import tpu as pltpu

# ------------------------- config (small shapes) -----------------------------
B, S = 2, 8            # batch, sequence length
VOCAB = 128            # vocab size (lane aligned -> one-hot gather is 1 MXU op)
EMB = 16               # ALBERT embedding_size
HID = 32               # n_embed / hidden_size
NHEAD = 4
HEAD = HID // NHEAD
INTER = 64             # intermediate (FFN) size
NLAYERS = 2            # ALBERT: one layer's weights shared across all layers
SEQ_LAYER = 1          # config['layer'] : which hidden state feeds the seq head
LN_EPS = 1e-12
CLS_PAD = 128          # lane-dense padded width of the 2-way classifier output
LANES = 128

_VMEM = functools.partial(pl.BlockSpec, memory_space=pltpu.MemorySpace.VMEM)

# ---- row offsets inside the packed "vectors" slab (biases / LN / pos / type) --
R_POS = 0                       # B*S rows of position embeddings (tiled over B)
R_TYPE0 = R_POS + B * S
R_TYPE1 = R_TYPE0 + 1
R_EG = R_TYPE1 + 1
R_EB = R_EG + 1
R_BPROJ = R_EB + 1
R_BQKV = R_BPROJ + 1            # [1, 3*HID]   (Q part pre-scaled by 1/sqrt(HEAD))
R_BO = R_BQKV + 1
R_LN1G = R_BO + 1
R_LN1B = R_LN1G + 1
R_BF = R_LN1B + 1
R_BFO = R_BF + 1
R_LN2G = R_BFO + 1
R_LN2B = R_LN2G + 1
R_MBD = R_LN2B + 1
R_MLNG = R_MBD + 1
R_MLNB = R_MLNG + 1
R_MBDEC = R_MLNB + 1
R_CB1 = R_MBDEC + 1
R_CB2 = R_CB1 + 1
VEC_ROWS = R_CB2 + 1            # 35

# ---- row offsets inside the packed weights slab (all lane-padded to 128) -----
W_EMB = 0                       # [VOCAB, EMB]
W_PROJ = W_EMB + VOCAB          # [EMB, HID]
W_QKV = W_PROJ + EMB            # [HID, 3*HID]  (Q columns pre-scaled)
W_O = W_QKV + HID               # [HID, HID]
W_F = W_O + HID                 # [HID, INTER]
W_FO = W_F + HID                # [INTER, HID]
W_MD = W_FO + INTER             # [HID, EMB]
W_MDEC = W_MD + HID             # [EMB, VOCAB]  (tied decoder)
W_C1 = W_MDEC + EMB             # [HID, HID]
W_C2 = W_C1 + HID               # [HID, CLS_PAD]
WMAT_ROWS = W_C2 + HID          # 416


# --------------------------- fused Pallas kernel ------------------------------
def fused_forward_kernel(tok_ref, mask_ref, vec_ref, wmat_ref,
                         mlm_out_ref, seq_out_ref):
    f32 = jnp.float32

    def ln(x, g_row, b_row, n):
        # single cross-lane pass: E[x], E[x^2]; clamp variance before rsqrt
        g = vec_ref[g_row:g_row + 1, 0:n]
        b = vec_ref[b_row:b_row + 1, 0:n]
        inv_n = 1.0 / n
        s1 = jnp.sum(x, axis=-1, keepdims=True)
        s2 = jnp.sum(x * x, axis=-1, keepdims=True)
        mu = s1 * inv_n
        var = jnp.maximum(s2 * inv_n - mu * mu, 0.0)
        return (x - mu) * jax.lax.rsqrt(var + LN_EPS) * g + b

    # ---- embeddings: one-hot gather on the MXU + pos/type adds + LayerNorm ----
    tok = tok_ref[...]                                  # [B*S, 2] int32 (id, type)
    ids = tok[:, 0:1]
    tt = tok[:, 1:2].astype(f32)
    iota = jax.lax.broadcasted_iota(jnp.int32, (B * S, VOCAB), 1)
    onehot = (iota == ids).astype(f32)                  # [B*S, VOCAB]
    wemb = wmat_ref[W_EMB:W_EMB + VOCAB, 0:EMB]
    word = jnp.dot(onehot, wemb, preferred_element_type=f32)        # [B*S, EMB]

    pos = vec_ref[R_POS:R_POS + B * S, 0:EMB]
    t0 = vec_ref[R_TYPE0:R_TYPE0 + 1, 0:EMB]
    t1 = vec_ref[R_TYPE1:R_TYPE1 + 1, 0:EMB]
    emb = word + pos + t0 + tt * (t1 - t0)
    emb = ln(emb, R_EG, R_EB, EMB)

    # embedding_hidden_mapping_in (E -> H)
    wproj = wmat_ref[W_PROJ:W_PROJ + EMB, 0:HID]
    bproj = vec_ref[R_BPROJ:R_BPROJ + 1, 0:HID]
    h = jnp.dot(emb, wproj, preferred_element_type=f32) + bproj     # [B*S, HID]

    # ---- shared ALBERT transformer layer, applied NLAYERS times ----
    addmask = mask_ref[...]                             # [B, 1, S] additive mask
    wqkv = wmat_ref[W_QKV:W_QKV + HID, 0:3 * HID]       # Q columns pre-scaled
    bqkv = vec_ref[R_BQKV:R_BQKV + 1, 0:3 * HID]
    wo = wmat_ref[W_O:W_O + HID, 0:HID]
    bo = vec_ref[R_BO:R_BO + 1, 0:HID]
    wf = wmat_ref[W_F:W_F + HID, 0:INTER]
    bf = vec_ref[R_BF:R_BF + 1, 0:INTER]
    wfo = wmat_ref[W_FO:W_FO + INTER, 0:HID]
    bfo = vec_ref[R_BFO:R_BFO + 1, 0:HID]

    def layer(x):                                       # x: [B*S, HID]
        # fused QKV: one full-depth matmul instead of 3*NHEAD*B tiny ones
        qkv = jnp.dot(x, wqkv, preferred_element_type=f32) + bqkv   # [B*S, 3H]
        ctx_heads = []
        for n in range(NHEAD):                          # static unroll (4 heads)
            off = n * HEAD
            q = qkv[:, off:off + HEAD].reshape(B, S, HEAD)
            k = qkv[:, HID + off:HID + off + HEAD].reshape(B, S, HEAD)
            v = qkv[:, 2 * HID + off:2 * HID + off + HEAD].reshape(B, S, HEAD)
            s = jnp.einsum('bqd,bkd->bqk', q, k,
                           preferred_element_type=f32) + addmask    # [B, S, S]
            m = jnp.max(s, axis=-1, keepdims=True)
            p = jnp.exp(s - m)
            l = jnp.sum(p, axis=-1, keepdims=True)
            c = jnp.einsum('bqk,bkd->bqd', p, v, preferred_element_type=f32)
            c = c * pl.reciprocal(l, approx=True)       # deferred softmax norm
            ctx_heads.append(c.reshape(B * S, HEAD))
        # concat heads along lanes -> one full-depth output projection
        ctx = jnp.concatenate(ctx_heads, axis=1)                    # [B*S, HID]
        attn = jnp.dot(ctx, wo, preferred_element_type=f32) + bo
        h1 = ln(x + attn, R_LN1G, R_LN1B, HID)

        f = jnp.dot(h1, wf, preferred_element_type=f32) + bf
        f = jax.nn.gelu(f, approximate=True)            # ALBERT gelu_new
        f = jnp.dot(f, wfo, preferred_element_type=f32) + bfo
        return ln(h1 + f, R_LN2G, R_LN2B, HID)

    h_seq = h                                           # hiddens[0]
    for li in range(NLAYERS):                           # weights shared (ALBERT)
        h = layer(h)
        if li + 1 == SEQ_LAYER:
            h_seq = h                                   # hiddens[SEQ_LAYER]

    # ---- MLM head: dense -> gelu -> LayerNorm -> tied decoder ----
    wd = wmat_ref[W_MD:W_MD + HID, 0:EMB]
    bd = vec_ref[R_MBD:R_MBD + 1, 0:EMB]
    d = jnp.dot(h, wd, preferred_element_type=f32) + bd
    d = jax.nn.gelu(d, approximate=True)
    d = ln(d, R_MLNG, R_MLNB, EMB)
    wdec = wmat_ref[W_MDEC:W_MDEC + EMB, 0:VOCAB]
    bdec = vec_ref[R_MBDEC:R_MBDEC + 1, 0:VOCAB]
    mlm_out_ref[...] = jnp.dot(d, wdec, preferred_element_type=f32) + bdec

    # ---- sequence head: hiddens[SEQ_LAYER][:, 0] -> Linear -> ReLU -> Linear ----
    cls = h_seq.reshape(B, S, HID)[:, 0, :]             # [B, HID]
    cw1 = wmat_ref[W_C1:W_C1 + HID, 0:HID]
    cb1 = vec_ref[R_CB1:R_CB1 + 1, 0:HID]
    cw2 = wmat_ref[W_C2:W_C2 + HID, 0:CLS_PAD]
    cb2 = vec_ref[R_CB2:R_CB2 + 1, 0:CLS_PAD]
    c = jnp.maximum(jnp.dot(cls, cw1, preferred_element_type=f32) + cb1, 0.0)
    seq_out_ref[...] = jnp.dot(c, cw2, preferred_element_type=f32) + cb2


# ---------------------------- Pallas wrapper ----------------------------------
def fused_forward(params, input_ids, attention_mask, token_type_ids):
    # only per-call prep: token packing + additive attention mask (tiny)
    tok = jnp.stack([input_ids.reshape(-1), token_type_ids.reshape(-1)],
                    axis=1).astype(jnp.int32)                        # [B*S, 2]
    addmask = ((1.0 - attention_mask.astype(jnp.float32)) * -10000.0
               ).reshape(B, 1, S)

    mlm_logits, seq_pad = pl.pallas_call(
        fused_forward_kernel,
        out_shape=(jax.ShapeDtypeStruct((B * S, VOCAB), jnp.float32),
                   jax.ShapeDtypeStruct((B, CLS_PAD), jnp.float32)),
        in_specs=[_VMEM(), _VMEM(), _VMEM(), _VMEM()],
        out_specs=(_VMEM(), _VMEM()),
        cost_estimate=pl.CostEstimate(flops=750_000, transcendentals=5_000,
                                      bytes_accessed=250_000),
    )(tok, addmask, params['vec'], params['wmat'])

    return mlm_logits.reshape(B, S, VOCAB), seq_pad[:, :2]


# ------------------------------ parameters ------------------------------------
def init_params(key):
    keys = iter(jax.random.split(key, 40))

    def w(shape, scale=0.02):
        return (scale * jax.random.normal(next(keys), shape)).astype(jnp.float32)

    zeros = lambda n: jnp.zeros((n,), jnp.float32)
    ones = lambda n: jnp.ones((n,), jnp.float32)

    # raw ALBERT-style parameters
    word_emb = w((VOCAB, EMB))
    pos_emb = w((S, EMB))
    type_emb = w((2, EMB))
    emb_ln_g, emb_ln_b = ones(EMB), zeros(EMB)
    wproj, bproj = w((EMB, HID)), zeros(HID)
    wq, bq = w((HID, HID)), zeros(HID)
    wk, bk = w((HID, HID)), zeros(HID)
    wv, bv = w((HID, HID)), zeros(HID)
    wo, bo = w((HID, HID)), zeros(HID)
    ln1_g, ln1_b = ones(HID), zeros(HID)
    wf, bf = w((HID, INTER)), zeros(INTER)
    wfo, bfo = w((INTER, HID)), zeros(HID)
    ln2_g, ln2_b = ones(HID), zeros(HID)
    mlm_wd, mlm_bd = w((HID, EMB)), zeros(EMB)
    mlm_ln_g, mlm_ln_b = ones(EMB), zeros(EMB)
    # TODO(synk): tied MLM decoder is a copy of word_emb.T at init (fine for this
    # inference-only forward; a true weight tie would be needed for training).
    mlm_wdec, mlm_bdec = word_emb.T, zeros(VOCAB)
    cls_w1, cls_b1 = w((HID, HID)), zeros(HID)
    cls_w2, cls_b2 = w((HID, 2)), zeros(2)

    # fold the attention scale into the Q projection (review item 5)
    scale = 1.0 / (HEAD ** 0.5)
    wqkv = jnp.concatenate([wq * scale, wk, wv], axis=1)            # [HID, 3H]
    bqkv = jnp.concatenate([bq * scale, bk, bv], axis=0)            # [3H]

    # ---- pack all bias / LN / pos / type rows into one [VEC_ROWS, 128] slab ----
    def row(v):
        v = jnp.asarray(v, jnp.float32).reshape(1, -1)
        return jnp.pad(v, ((0, 0), (0, LANES - v.shape[1])))

    pos_flat = jnp.tile(pos_emb, (B, 1))                            # [B*S, EMB]
    vec_rows = [jnp.pad(pos_flat, ((0, 0), (0, LANES - EMB)))]
    for v in (type_emb[0], type_emb[1], emb_ln_g, emb_ln_b, bproj, bqkv, bo,
              ln1_g, ln1_b, bf, bfo, ln2_g, ln2_b, mlm_bd, mlm_ln_g, mlm_ln_b,
              mlm_bdec, cls_b1, cls_b2):
        vec_rows.append(row(v))
    vec = jnp.concatenate(vec_rows, axis=0)
    assert vec.shape == (VEC_ROWS, LANES)

    # ---- pack all weight matrices into one [WMAT_ROWS, 128] slab ----
    def wpad(m):
        m = jnp.asarray(m, jnp.float32)
        return jnp.pad(m, ((0, 0), (0, LANES - m.shape[1])))

    wmat = jnp.concatenate([
        wpad(word_emb), wpad(wproj), wpad(wqkv), wpad(wo), wpad(wf),
        wpad(wfo), wpad(mlm_wd), wpad(mlm_wdec), wpad(cls_w1), wpad(cls_w2),
    ], axis=0)
    assert wmat.shape == (WMAT_ROWS, LANES)

    return {'vec': vec, 'wmat': wmat}


# ------------------------------ forward pass ----------------------------------
@jax.jit
def forward(params, input_ids, attention_mask, token_type_ids, labels, seq_labels):
    logits, seq_logits = fused_forward(params, input_ids, attention_mask,
                                       token_type_ids)

    # --- MLM loss / acc (tiny reductions: plain JAX glue) ---
    # TODO(synk): MLM loss averages over all positions (no -100 ignore_index
    # labels are produced by this synthetic setup), matching CrossEntropyLoss
    # on fully-labeled positions.
    logp = jax.nn.log_softmax(logits, axis=-1)
    mlm_loss = -jnp.mean(jnp.take_along_axis(logp, labels[..., None], axis=-1))
    mlm_acc = jnp.mean((jnp.argmax(logits, axis=2) == labels).astype(jnp.float32))

    # --- sequence head loss / acc ---
    slogp = jax.nn.log_softmax(seq_logits, axis=-1)
    seq_loss = -jnp.mean(jnp.take_along_axis(slogp, seq_labels[:, None], axis=-1))
    seq_acc = jnp.mean((jnp.argmax(seq_logits, axis=1) == seq_labels)
                       .astype(jnp.float32))

    return mlm_loss, mlm_acc, seq_loss, seq_acc


# ---------------------------------- main --------------------------------------
if __name__ == "__main__":
    key = jax.random.PRNGKey(0)
    kp, k1, k2, k3 = jax.random.split(key, 4)

    params = init_params(kp)

    input_ids = jax.random.randint(k1, (B, S), 0, VOCAB, dtype=jnp.int32)
    attention_mask = jnp.ones((B, S), jnp.int32).at[1, -2:].set(0)
    token_type_ids = jnp.zeros((B, S), jnp.int32)
    labels = jax.random.randint(k2, (B, S), 0, VOCAB, dtype=jnp.int32)
    seq_labels = jax.random.randint(k3, (B,), 0, 2, dtype=jnp.int32)

    outs = forward(params, input_ids, attention_mask, token_type_ids,
                   labels, seq_labels)
    outs = jax.block_until_ready(outs)

    mlm_loss, mlm_acc, seq_loss, seq_acc = outs
    assert jnp.isfinite(mlm_loss) and jnp.isfinite(seq_loss)
    assert jnp.isfinite(mlm_acc) and jnp.isfinite(seq_acc)
    print("KERNEL_OK")
</pallas_src>

<mosaic_0001>
module attributes {stable_mosaic.version = 11 : i64} {
  func.func @fused_forward_kernel(%arg0: memref<16x2xi32, #tpu.memory_space<vmem>>, %arg1: memref<2x1x8xf32, #tpu.memory_space<vmem>>, %arg2: memref<35x128xf32, #tpu.memory_space<vmem>>, %arg3: memref<416x128xf32, #tpu.memory_space<vmem>>, %arg4: memref<16x128xf32, #tpu.memory_space<vmem>>, %arg5: memref<2x128xf32, #tpu.memory_space<vmem>>) attributes {dimension_semantics = [], scalar_prefetch = 0 : i64, scratch_operands = 0 : i64, tpu.core_type = #tpu.core_type<tc>} {
    %c0 = arith.constant 0 : index
    %c0_0 = arith.constant 0 : index
    %0 = vector.load %arg0[%c0, %c0_0] : memref<16x2xi32, #tpu.memory_space<vmem>>, vector<16x2xi32>
    %1 = vector.extract_strided_slice %0 {offsets = [0, 0], sizes = [16, 1], strides = [1, 1]} : vector<16x2xi32> to vector<16x1xi32>
    %2 = vector.extract_strided_slice %0 {offsets = [0, 1], sizes = [16, 1], strides = [1, 1]} : vector<16x2xi32> to vector<16x1xi32>
    %3 = arith.sitofp %2 : vector<16x1xi32> to vector<16x1xf32>
    %4 = tpu.iota {dimensions = array<i32: 1>} : vector<16x128xi32>
    %5 = vector.broadcast %1 : vector<16x1xi32> to vector<16x128xi32>
    %6 = arith.cmpi eq, %4, %5 : vector<16x128xi32>
    %7 = arith.extui %6 : vector<16x128xi1> to vector<16x128xi32>
    %8 = arith.sitofp %7 : vector<16x128xi32> to vector<16x128xf32>
    %c0_1 = arith.constant 0 : index
    %c0_2 = arith.constant 0 : index
    %9 = vector.load %arg3[%c0_1, %c0_2] : memref<416x128xf32, #tpu.memory_space<vmem>>, vector<128x16xf32>
    %cst = arith.constant dense<0.000000e+00> : vector<16x16xf32>
    %10 = tpu.matmul %8, %9, %cst {dimension_numbers = #tpu.dot_dimension_numbers<[1], [0], [0], [1], [0, 0, 1, 1], [], []>} : vector<16x128xf32>, vector<128x16xf32>, vector<16x16xf32> -> vector<16x16xf32>
    %c0_3 = arith.constant 0 : index
    %c0_4 = arith.constant 0 : index
    %11 = vector.load %arg2[%c0_3, %c0_4] : memref<35x128xf32, #tpu.memory_space<vmem>>, vector<16x16xf32>
    %c16 = arith.constant 16 : index
    %c0_5 = arith.constant 0 : index
    %12 = vector.load %arg2[%c16, %c0_5] : memref<35x128xf32, #tpu.memory_space<vmem>>, vector<1x16xf32>
    %c17 = arith.constant 17 : index
    %c0_6 = arith.constant 0 : index
    %13 = vector.load %arg2[%c17, %c0_6] : memref<35x128xf32, #tpu.memory_space<vmem>>, vector<1x16xf32>
    %14 = arith.addf %10, %11 : vector<16x16xf32>
    %15 = vector.broadcast %12 : vector<1x16xf32> to vector<16x16xf32>
    %16 = arith.addf %14, %15 : vector<16x16xf32>
    %17 = arith.subf %13, %12 : vector<1x16xf32>
    %18 = vector.broadcast %3 : vector<16x1xf32> to vector<16x16xf32>
    %19 = vector.broadcast %17 : vector<1x16xf32> to vector<16x16xf32>
    %20 = arith.mulf %18, %19 : vector<16x16xf32>
    %21 = arith.addf %16, %20 : vector<16x16xf32>
    %c18 = arith.constant 18 : index
    %c0_7 = arith.constant 0 : index
    %22 = vector.load %arg2[%c18, %c0_7] : memref<35x128xf32, #tpu.memory_space<vmem>>, vector<1x16xf32>
    %c19 = arith.constant 19 : index
    %c0_8 = arith.constant 0 : index
    %23 = vector.load %arg2[%c19, %c0_8] : memref<35x128xf32, #tpu.memory_space<vmem>>, vector<1x16xf32>
    %cst_9 = arith.constant dense<0.000000e+00> : vector<16xf32>
    %24 = vector.multi_reduction <add>, %21, %cst_9 [1] : vector<16x16xf32> to vector<16xf32>
    %25 = vector.shape_cast %24 : vector<16xf32> to vector<16x1xf32>
    %26 = arith.mulf %21, %21 : vector<16x16xf32>
    %cst_10 = arith.constant dense<0.000000e+00> : vector<16xf32>
    %27 = vector.multi_reduction <add>, %26, %cst_10 [1] : vector<16x16xf32> to vector<16xf32>
    %28 = vector.shape_cast %27 : vector<16xf32> to vector<16x1xf32>
    %cst_11 = arith.constant 6.250000e-02 : f32
    %29 = vector.broadcast %cst_11 : f32 to vector<16x1xf32>
    %30 = arith.mulf %25, %29 : vector<16x1xf32>
    %cst_12 = arith.constant 6.250000e-02 : f32
    %31 = vector.broadcast %cst_12 : f32 to vector<16x1xf32>
    %32 = arith.mulf %28, %31 : vector<16x1xf32>
    %33 = arith.mulf %30, %30 : vector<16x1xf32>
    %34 = arith.subf %32, %33 : vector<16x1xf32>
    %cst_13 = arith.constant 0.000000e+00 : f32
    %35 = vector.broadcast %cst_13 : f32 to vector<16x1xf32>
    %36 = arith.maximumf %34, %35 : vector<16x1xf32>
    %37 = vector.broadcast %30 : vector<16x1xf32> to vector<16x16xf32>
    %38 = arith.subf %21, %37 : vector<16x16xf32>
    %cst_14 = arith.constant 9.99999996E-13 : f32
    %39 = vector.broadcast %cst_14 : f32 to vector<16x1xf32>
    %40 = arith.addf %36, %39 : vector<16x1xf32>
    %41 = math.rsqrt %40 : vector<16x1xf32>
    %42 = vector.broadcast %41 : vector<16x1xf32> to vector<16x16xf32>
    %43 = arith.mulf %38, %42 : vector<16x16xf32>
    %44 = vector.broadcast %22 : vector<1x16xf32> to vector<16x16xf32>
    %45 = arith.mulf %43, %44 : vector<16x16xf32>
    %46 = vector.broadcast %23 : vector<1x16xf32> to vector<16x16xf32>
    %47 = arith.addf %45, %46 : vector<16x16xf32>
    %c128 = arith.constant 128 : index
    %c0_15 = arith.constant 0 : index
    %48 = vector.load %arg3[%c128, %c0_15] : memref<416x128xf32, #tpu.memory_space<vmem>>, vector<16x32xf32>
    %c20 = arith.constant 20 : index
    %c0_16 = arith.constant 0 : index
    %49 = vector.load %arg2[%c20, %c0_16] : memref<35x128xf32, #tpu.memory_space<vmem>>, vector<1x32xf32>
    %cst_17 = arith.constant dense<0.000000e+00> : vector<16x32xf32>
    %50 = tpu.matmul %47, %48, %cst_17 {dimension_numbers = #tpu.dot_dimension_numbers<[1], [0], [0], [1], [0, 0, 1, 1], [], []>} : vector<16x16xf32>, vector<16x32xf32>, vector<16x32xf32> -> vector<16x32xf32>
    %51 = vector.broadcast %49 : vector<1x32xf32> to vector<16x32xf32>
    %52 = arith.addf %50, %51 : vector<16x32xf32>
    %c0_18 = arith.constant 0 : index
    %c0_19 = arith.constant 0 : index
    %c0_20 = arith.constant 0 : index
    %53 = vector.load %arg1[%c0_18, %c0_19, %c0_20] : memref<2x1x8xf32, #tpu.memory_space<vmem>>, vector<2x1x8xf32>
    %c144 = arith.constant 144 : index
    %c0_21 = arith.constant 0 : index
    %54 = vector.load %arg3[%c144, %c0_21] : memref<416x128xf32, #tpu.memory_space<vmem>>, vector<32x96xf32>
    %c21 = arith.constant 21 : index
    %c0_22 = arith.constant 0 : index
    %55 = vector.load %arg2[%c21, %c0_22] : memref<35x128xf32, #tpu.memory_space<vmem>>, vector<1x96xf32>
    %c176 = arith.constant 176 : index
    %c0_23 = arith.constant 0 : index
    %56 = vector.load %arg3[%c176, %c0_23] : memref<416x128xf32, #tpu.memory_space<vmem>>, vector<32x32xf32>
    %c22 = arith.constant 22 : index
    %c0_24 = arith.constant 0 : index
    %57 = vector.load %arg2[%c22, %c0_24] : memref<35x128xf32, #tpu.memory_space<vmem>>, vector<1x32xf32>
    %c208 = arith.constant 208 : index
    %c0_25 = arith.constant 0 : index
    %58 = vector.load %arg3[%c208, %c0_25] : memref<416x128xf32, #tpu.memory_space<vmem>>, vector<32x64xf32>
    %c25 = arith.constant 25 : index
    %c0_26 = arith.constant 0 : index
    %59 = vector.load %arg2[%c25, %c0_26] : memref<35x128xf32, #tpu.memory_space<vmem>>, vector<1x64xf32>
    %c240 = arith.constant 240 : index
    %c0_27 = arith.constant 0 : index
    %60 = vector.load %arg3[%c240, %c0_27] : memref<416x128xf32, #tpu.memory_space<vmem>>, vector<64x32xf32>
    %c26 = arith.constant 26 : index
    %c0_28 = arith.constant 0 : index
    %61 = vector.load %arg2[%c26, %c0_28] : memref<35x128xf32, #tpu.memory_space<vmem>>, vector<1x32xf32>
    %cst_29 = arith.constant dense<0.000000e+00> : vector<16x96xf32>
    %62 = tpu.matmul %52, %54, %cst_29 {dimension_numbers = #tpu.dot_dimension_numbers<[1], [0], [0], [1], [0, 0, 1, 1], [], []>} : vector<16x32xf32>, vector<32x96xf32>, vector<16x96xf32> -> vector<16x96xf32>
    %63 = vector.broadcast %55 : vector<1x96xf32> to vector<16x96xf32>
    %64 = arith.addf %62, %63 : vector<16x96xf32>
    %65 = vector.extract_strided_slice %64 {offsets = [0, 0], sizes = [16, 8], strides = [1, 1]} : vector<16x96xf32> to vector<16x8xf32>
    %66 = vector.shape_cast %65 : vector<16x8xf32> to vector<2x8x8xf32>
    %67 = vector.extract_strided_slice %64 {offsets = [0, 32], sizes = [16, 8], strides = [1, 1]} : vector<16x96xf32> to vector<16x8xf32>
    %68 = vector.shape_cast %67 : vector<16x8xf32> to vector<2x8x8xf32>
    %69 = vector.extract_strided_slice %64 {offsets = [0, 64], sizes = [16, 8], strides = [1, 1]} : vector<16x96xf32> to vector<16x8xf32>
    %70 = vector.shape_cast %69 : vector<16x8xf32> to vector<2x8x8xf32>
    "tpu.trace_start"() <{level = 10 : i32, message = "bqd,bkd->bqk"}> : () -> ()
    %cst_30 = arith.constant dense<0.000000e+00> : vector<2x8x8xf32>
    %71 = tpu.matmul %66, %68, %cst_30 {dimension_numbers = #tpu.dot_dimension_numbers<[2], [2], [1], [1], [0, 0, 0, 1, 1, 1], [0], [0]>} : vector<2x8x8xf32>, vector<2x8x8xf32>, vector<2x8x8xf32> -> vector<2x8x8xf32>
    "tpu.trace_stop"() : () -> ()
    %72 = vector.broadcast %53 : vector<2x1x8xf32> to vector<2x8x8xf32>
    %73 = arith.addf %71, %72 : vector<2x8x8xf32>
    %cst_31 = arith.constant dense<0xFF800000> : vector<2x8xf32>
    %74 = vector.multi_reduction <maximumf>, %73, %cst_31 [2] : vector<2x8x8xf32> to vector<2x8xf32>
    %75 = vector.shape_cast %74 : vector<2x8xf32> to vector<2x8x1xf32>
    %76 = vector.broadcast %75 : vector<2x8x1xf32> to vector<2x8x8xf32>
    %77 = arith.subf %73, %76 : vector<2x8x8xf32>
    %78 = math.exp %77 : vector<2x8x8xf32>
    %cst_32 = arith.constant dense<0.000000e+00> : vector<2x8xf32>
    %79 = vector.multi_reduction <add>, %78, %cst_32 [2] : vector<2x8x8xf32> to vector<2x8xf32>
    %80 = vector.shape_cast %79 : vector<2x8xf32> to vector<2x8x1xf32>
    "tpu.trace_start"() <{level = 10 : i32, message = "bqk,bkd->bqd"}> : () -> ()
    %cst_33 = arith.constant dense<0.000000e+00> : vector<2x8x8xf32>
    %81 = tpu.matmul %78, %70, %cst_33 {dimension_numbers = #tpu.dot_dimension_numbers<[2], [1], [1], [2], [0, 0, 0, 1, 1, 2], [0], [0]>} : vector<2x8x8xf32>, vector<2x8x8xf32>, vector<2x8x8xf32> -> vector<2x8x8xf32>
    "tpu.trace_stop"() : () -> ()
    %82 = tpu.reciprocal %80 {approx = true} : vector<2x8x1xf32> -> vector<2x8x1xf32>
    %83 = vector.broadcast %82 : vector<2x8x1xf32> to vector<2x8x8xf32>
    %84 = arith.mulf %81, %83 : vector<2x8x8xf32>
    %85 = vector.shape_cast %84 : vector<2x8x8xf32> to vector<16x8xf32>
    %86 = vector.extract_strided_slice %64 {offsets = [0, 8], sizes = [16, 8], strides = [1, 1]} : vector<16x96xf32> to vector<16x8xf32>
    %87 = vector.shape_cast %86 : vector<16x8xf32> to vector<2x8x8xf32>
    %88 = vector.extract_strided_slice %64 {offsets = [0, 40], sizes = [16, 8], strides = [1, 1]} : vector<16x96xf32> to vector<16x8xf32>
    %89 = vector.shape_cast %88 : vector<16x8xf32> to vector<2x8x8xf32>
    %90 = vector.extract_strided_slice %64 {offsets = [0, 72], sizes = [16, 8], strides = [1, 1]} : vector<16x96xf32> to vector<16x8xf32>
    %91 = vector.shape_cast %90 : vector<16x8xf32> to vector<2x8x8xf32>
    "tpu.trace_start"() <{level = 10 : i32, message = "bqd,bkd->bqk"}> : () -> ()
    %cst_34 = arith.constant dense<0.000000e+00> : vector<2x8x8xf32>
    %92 = tpu.matmul %87, %89, %cst_34 {dimension_numbers = #tpu.dot_dimension_numbers<[2], [2], [1], [1], [0, 0, 0, 1, 1, 1], [0], [0]>} : vector<2x8x8xf32>, vector<2x8x8xf32>, vector<2x8x8xf32> -> vector<2x8x8xf32>
    "tpu.trace_stop"() : () -> ()
    %93 = vector.broadcast %53 : vector<2x1x8xf32> to vector<2x8x8xf32>
    %94 = arith.addf %92, %93 : vector<2x8x8xf32>
    %cst_35 = arith.constant dense<0xFF800000> : vector<2x8xf32>
    %95 = vector.multi_reduction <maximumf>, %94, %cst_35 [2] : vector<2x8x8xf32> to vector<2x8xf32>
    %96 = vector.shape_cast %95 : vector<2x8xf32> to vector<2x8x1xf32>
    %97 = vector.broadcast %96 : vector<2x8x1xf32> to vector<2x8x8xf32>
    %98 = arith.subf %94, %97 : vector<2x8x8xf32>
    %99 = math.exp %98 : vector<2x8x8xf32>
    %cst_36 = arith.constant dense<0.000000e+00> : vector<2x8xf32>
    %100 = vector.multi_reduction <add>, %99, %cst_36 [2] : vector<2x8x8xf32> to vector<2x8xf32>
    %101 = vector.shape_cast %100 : vector<2x8xf32> to vector<2x8x1xf32>
    "tpu.trace_start"() <{level = 10 : i32, message = "bqk,bkd->bqd"}> : () -> ()
    %cst_37 = arith.constant dense<0.000000e+00> : vector<2x8x8xf32>
    %102 = tpu.matmul %99, %91, %cst_37 {dimension_numbers = #tpu.dot_dimension_numbers<[2], [1], [1], [2], [0, 0, 0, 1, 1, 2], [0], [0]>} : vector<2x8x8xf32>, vector<2x8x8xf32>, vector<2x8x8xf32> -> vector<2x8x8xf32>
    "tpu.trace_stop"() : () -> ()
    %103 = tpu.reciprocal %101 {approx = true} : vector<2x8x1xf32> -> vector<2x8x1xf32>
    %104 = vector.broadcast %103 : vector<2x8x1xf32> to vector<2x8x8xf32>
    %105 = arith.mulf %102, %104 : vector<2x8x8xf32>
    %106 = vector.shape_cast %105 : vector<2x8x8xf32> to vector<16x8xf32>
    %107 = vector.extract_strided_slice %64 {offsets = [0, 16], sizes = [16, 8], strides = [1, 1]} : vector<16x96xf32> to vector<16x8xf32>
    %108 = vector.shape_cast %107 : vector<16x8xf32> to vector<2x8x8xf32>
    %109 = vector.extract_strided_slice %64 {offsets = [0, 48], sizes = [16, 8], strides = [1, 1]} : vector<16x96xf32> to vector<16x8xf32>
    %110 = vector.shape_cast %109 : vector<16x8xf32> to vector<2x8x8xf32>
    %111 = vector.extract_strided_slice %64 {offsets = [0, 80], sizes = [16, 8], strides = [1, 1]} : vector<16x96xf32> to vector<16x8xf32>
    %112 = vector.shape_cast %111 : vector<16x8xf32> to vector<2x8x8xf32>
    "tpu.trace_start"() <{level = 10 : i32, message = "bqd,bkd->bqk"}> : () -> ()
    %cst_38 = arith.constant dense<0.000000e+00> : vector<2x8x8xf32>
    %113 = tpu.matmul %108, %110, %cst_38 {dimension_numbers = #tpu.dot_dimension_numbers<[2], [2], [1], [1], [0, 0, 0, 1, 1, 1], [0], [0]>} : vector<2x8x8xf32>, vector<2x8x8xf32>, vector<2x8x8xf32> -> vector<2x8x8xf32>
    "tpu.trace_stop"() : () -> ()
    %114 = vector.broadcast %53 : vector<2x1x8xf32> to vector<2x8x8xf32>
    %115 = arith.addf %113, %114 : vector<2x8x8xf32>
    %cst_39 = arith.constant dense<0xFF800000> : vector<2x8xf32>
    %116 = vector.multi_reduction <maximumf>, %115, %cst_39 [2] : vector<2x8x8xf32> to vector<2x8xf32>
    %117 = vector.shape_cast %116 : vector<2x8xf32> to vector<2x8x1xf32>
    %118 = vector.broadcast %117 : vector<2x8x1xf32> to vector<2x8x8xf32>
    %119 = arith.subf %115, %118 : vector<2x8x8xf32>
    %120 = math.exp %119 : vector<2x8x8xf32>
    %cst_40 = arith.constant dense<0.000000e+00> : vector<2x8xf32>
    %121 = vector.multi_reduction <add>, %120, %cst_40 [2] : vector<2x8x8xf32> to vector<2x8xf32>
    %122 = vector.shape_cast %121 : vector<2x8xf32> to vector<2x8x1xf32>
    "tpu.trace_start"() <{level = 10 : i32, message = "bqk,bkd->bqd"}> : () -> ()
    %cst_41 = arith.constant dense<0.000000e+00> : vector<2x8x8xf32>
    %123 = tpu.matmul %120, %112, %cst_41 {dimension_numbers = #tpu.dot_dimension_numbers<[2], [1], [1], [2], [0, 0, 0, 1, 1, 2], [0], [0]>} : vector<2x8x8xf32>, vector<2x8x8xf32>, vector<2x8x8xf32> -> vector<2x8x8xf32>
    "tpu.trace_stop"() : () -> ()
    %124 = tpu.reciprocal %122 {approx = true} : vector<2x8x1xf32> -> vector<2x8x1xf32>
    %125 = vector.broadcast %124 : vector<2x8x1xf32> to vector<2x8x8xf32>
    %126 = arith.mulf %123, %125 : vector<2x8x8xf32>
    %127 = vector.shape_cast %126 : vector<2x8x8xf32> to vector<16x8xf32>
    %128 = vector.extract_strided_slice %64 {offsets = [0, 24], sizes = [16, 8], strides = [1, 1]} : vector<16x96xf32> to vector<16x8xf32>
    %129 = vector.shape_cast %128 : vector<16x8xf32> to vector<2x8x8xf32>
    %130 = vector.extract_strided_slice %64 {offsets = [0, 56], sizes = [16, 8], strides = [1, 1]} : vector<16x96xf32> to vector<16x8xf32>
    %131 = vector.shape_cast %130 : vector<16x8xf32> to vector<2x8x8xf32>
    %132 = vector.extract_strided_slice %64 {offsets = [0, 88], sizes = [16, 8], strides = [1, 1]} : vector<16x96xf32> to vector<16x8xf32>
    %133 = vector.shape_cast %132 : vector<16x8xf32> to vector<2x8x8xf32>
    "tpu.trace_start"() <{level = 10 : i32, message = "bqd,bkd->bqk"}> : () -> ()
    %cst_42 = arith.constant dense<0.000000e+00> : vector<2x8x8xf32>
    %134 = tpu.matmul %129, %131, %cst_42 {dimension_numbers = #tpu.dot_dimension_numbers<[2], [2], [1], [1], [0, 0, 0, 1, 1, 1], [0], [0]>} : vector<2x8x8xf32>, vector<2x8x8xf32>, vector<2x8x8xf32> -> vector<2x8x8xf32>
    "tpu.trace_stop"() : () -> ()
    %135 = vector.broadcast %53 : vector<2x1x8xf32> to vector<2x8x8xf32>
    %136 = arith.addf %134, %135 : vector<2x8x8xf32>
    %cst_43 = arith.constant dense<0xFF800000> : vector<2x8xf32>
    %137 = vector.multi_reduction <maximumf>, %136, %cst_43 [2] : vector<2x8x8xf32> to vector<2x8xf32>
    %138 = vector.shape_cast %137 : vector<2x8xf32> to vector<2x8x1xf32>
    %139 = vector.broadcast %138 : vector<2x8x1xf32> to vector<2x8x8xf32>
    %140 = arith.subf %136, %139 : vector<2x8x8xf32>
    %141 = math.exp %140 : vector<2x8x8xf32>
    %cst_44 = arith.constant dense<0.000000e+00> : vector<2x8xf32>
    %142 = vector.multi_reduction <add>, %141, %cst_44 [2] : vector<2x8x8xf32> to vector<2x8xf32>
    %143 = vector.shape_cast %142 : vector<2x8xf32> to vector<2x8x1xf32>
    "tpu.trace_start"() <{level = 10 : i32, message = "bqk,bkd->bqd"}> : () -> ()
    %cst_45 = arith.constant dense<0.000000e+00> : vector<2x8x8xf32>
    %144 = tpu.matmul %141, %133, %cst_45 {dimension_numbers = #tpu.dot_dimension_numbers<[2], [1], [1], [2], [0, 0, 0, 1, 1, 2], [0], [0]>} : vector<2x8x8xf32>, vector<2x8x8xf32>, vector<2x8x8xf32> -> vector<2x8x8xf32>
    "tpu.trace_stop"() : () -> ()
    %145 = tpu.reciprocal %143 {approx = true} : vector<2x8x1xf32> -> vector<2x8x1xf32>
    %146 = vector.broadcast %145 : vector<2x8x1xf32> to vector<2x8x8xf32>
    %147 = arith.mulf %144, %146 : vector<2x8x8xf32>
    %148 = vector.shape_cast %147 : vector<2x8x8xf32> to vector<16x8xf32>
    %149 = tpu.concatenate %85, %106, %127, %148 in 1 : vector<16x8xf32>, vector<16x8xf32>, vector<16x8xf32>, vector<16x8xf32> -> vector<16x32xf32>
    %cst_46 = arith.constant dense<0.000000e+00> : vector<16x32xf32>
    %150 = tpu.matmul %149, %56, %cst_46 {dimension_numbers = #tpu.dot_dimension_numbers<[1], [0], [0], [1], [0, 0, 1, 1], [], []>} : vector<16x32xf32>, vector<32x32xf32>, vector<16x32xf32> -> vector<16x32xf32>
    %151 = vector.broadcast %57 : vector<1x32xf32> to vector<16x32xf32>
    %152 = arith.addf %150, %151 : vector<16x32xf32>
    %153 = arith.addf %52, %152 : vector<16x32xf32>
    %c23 = arith.constant 23 : index
    %c0_47 = arith.constant 0 : index
    %154 = vector.load %arg2[%c23, %c0_47] : memref<35x128xf32, #tpu.memory_space<vmem>>, vector<1x32xf32>
    %c24 = arith.constant 24 : index
    %c0_48 = arith.constant 0 : index
    %155 = vector.load %arg2[%c24, %c0_48] : memref<35x128xf32, #tpu.memory_space<vmem>>, vector<1x32xf32>
    %cst_49 = arith.constant dense<0.000000e+00> : vector<16xf32>
    %156 = vector.multi_reduction <add>, %153, %cst_49 [1] : vector<16x32xf32> to vector<16xf32>
    %157 = vector.shape_cast %156 : vector<16xf32> to vector<16x1xf32>
    %158 = arith.mulf %153, %153 : vector<16x32xf32>
    %cst_50 = arith.constant dense<0.000000e+00> : vector<16xf32>
    %159 = vector.multi_reduction <add>, %158, %cst_50 [1] : vector<16x32xf32> to vector<16xf32>
    %160 = vector.shape_cast %159 : vector<16xf32> to vector<16x1xf32>
    %cst_51 = arith.constant 3.125000e-02 : f32
    %161 = vector.broadcast %cst_51 : f32 to vector<16x1xf32>
    %162 = arith.mulf %157, %161 : vector<16x1xf32>
    %cst_52 = arith.constant 3.125000e-02 : f32
    %163 = vector.broadcast %cst_52 : f32 to vector<16x1xf32>
    %164 = arith.mulf %160, %163 : vector<16x1xf32>
    %165 = arith.mulf %162, %162 : vector<16x1xf32>
    %166 = arith.subf %164, %165 : vector<16x1xf32>
    %cst_53 = arith.constant 0.000000e+00 : f32
    %167 = vector.broadcast %cst_53 : f32 to vector<16x1xf32>
    %168 = arith.maximumf %166, %167 : vector<16x1xf32>
    %169 = vector.broadcast %162 : vector<16x1xf32> to vector<16x32xf32>
    %170 = arith.subf %153, %169 : vector<16x32xf32>
    %cst_54 = arith.constant 9.99999996E-13 : f32
    %171 = vector.broadcast %cst_54 : f32 to vector<16x1xf32>
    %172 = arith.addf %168, %171 : vector<16x1xf32>
    %173 = math.rsqrt %172 : vector<16x1xf32>
    %174 = vector.broadcast %173 : vector<16x1xf32> to vector<16x32xf32>
    %175 = arith.mulf %170, %174 : vector<16x32xf32>
    %176 = vector.broadcast %154 : vector<1x32xf32> to vector<16x32xf32>
    %177 = arith.mulf %175, %176 : vector<16x32xf32>
    %178 = vector.broadcast %155 : vector<1x32xf32> to vector<16x32xf32>
    %179 = arith.addf %177, %178 : vector<16x32xf32>
    %cst_55 = arith.constant dense<0.000000e+00> : vector<16x64xf32>
    %180 = tpu.matmul %179, %58, %cst_55 {dimension_numbers = #tpu.dot_dimension_numbers<[1], [0], [0], [1], [0, 0, 1, 1], [], []>} : vector<16x32xf32>, vector<32x64xf32>, vector<16x64xf32> -> vector<16x64xf32>
    %181 = vector.broadcast %59 : vector<1x64xf32> to vector<16x64xf32>
    %182 = arith.addf %180, %181 : vector<16x64xf32>
    %183 = arith.mulf %182, %182 : vector<16x64xf32>
    %184 = arith.mulf %182, %183 : vector<16x64xf32>
    %cst_56 = arith.constant 4.471500e-02 : f32
    %185 = vector.broadcast %cst_56 : f32 to vector<16x64xf32>
    %186 = arith.mulf %185, %184 : vector<16x64xf32>
    %187 = arith.addf %182, %186 : vector<16x64xf32>
    %cst_57 = arith.constant 0.797884583 : f32
    %188 = vector.broadcast %cst_57 : f32 to vector<16x64xf32>
    %189 = arith.mulf %188, %187 : vector<16x64xf32>
    %190 = math.tanh %189 : vector<16x64xf32>
    %cst_58 = arith.constant 1.000000e+00 : f32
    %191 = vector.broadcast %cst_58 : f32 to vector<16x64xf32>
    %192 = arith.addf %191, %190 : vector<16x64xf32>
    %cst_59 = arith.constant 5.000000e-01 : f32
    %193 = vector.broadcast %cst_59 : f32 to vector<16x64xf32>
    %194 = arith.mulf %193, %192 : vector<16x64xf32>
    %195 = arith.mulf %182, %194 : vector<16x64xf32>
    %cst_60 = arith.constant dense<0.000000e+00> : vector<16x32xf32>
    %196 = tpu.matmul %195, %60, %cst_60 {dimension_numbers = #tpu.dot_dimension_numbers<[1], [0], [0], [1], [0, 0, 1, 1], [], []>} : vector<16x64xf32>, vector<64x32xf32>, vector<16x32xf32> -> vector<16x32xf32>
    %197 = vector.broadcast %61 : vector<1x32xf32> to vector<16x32xf32>
    %198 = arith.addf %196, %197 : vector<16x32xf32>
    %199 = arith.addf %179, %198 : vector<16x32xf32>
    %c27 = arith.constant 27 : index
    %c0_61 = arith.constant 0 : index
    %200 = vector.load %arg2[%c27, %c0_61] : memref<35x128xf32, #tpu.memory_space<vmem>>, vector<1x32xf32>
    %c28 = arith.constant 28 : index
    %c0_62 = arith.constant 0 : index
    %201 = vector.load %arg2[%c28, %c0_62] : memref<35x128xf32, #tpu.memory_space<vmem>>, vector<1x32xf32>
    %cst_63 = arith.constant dense<0.000000e+00> : vector<16xf32>
    %202 = vector.multi_reduction <add>, %199, %cst_63 [1] : vector<16x32xf32> to vector<16xf32>
    %203 = vector.shape_cast %202 : vector<16xf32> to vector<16x1xf32>
    %204 = arith.mulf %199, %199 : vector<16x32xf32>
    %cst_64 = arith.constant dense<0.000000e+00> : vector<16xf32>
    %205 = vector.multi_reduction <add>, %204, %cst_64 [1] : vector<16x32xf32> to vector<16xf32>
    %206 = vector.shape_cast %205 : vector<16xf32> to vector<16x1xf32>
    %cst_65 = arith.constant 3.125000e-02 : f32
    %207 = vector.broadcast %cst_65 : f32 to vector<16x1xf32>
    %208 = arith.mulf %203, %207 : vector<16x1xf32>
    %cst_66 = arith.constant 3.125000e-02 : f32
    %209 = vector.broadcast %cst_66 : f32 to vector<16x1xf32>
    %210 = arith.mulf %206, %209 : vector<16x1xf32>
    %211 = arith.mulf %208, %208 : vector<16x1xf32>
    %212 = arith.subf %210, %211 : vector<16x1xf32>
    %cst_67 = arith.constant 0.000000e+00 : f32
    %213 = vector.broadcast %cst_67 : f32 to vector<16x1xf32>
    %214 = arith.maximumf %212, %213 : vector<16x1xf32>
    %215 = vector.broadcast %208 : vector<16x1xf32> to vector<16x32xf32>
    %216 = arith.subf %199, %215 : vector<16x32xf32>
    %cst_68 = arith.constant 9.99999996E-13 : f32
    %217 = vector.broadcast %cst_68 : f32 to vector<16x1xf32>
    %218 = arith.addf %214, %217 : vector<16x1xf32>
    %219 = math.rsqrt %218 : vector<16x1xf32>
    %220 = vector.broadcast %219 : vector<16x1xf32> to vector<16x32xf32>
    %221 = arith.mulf %216, %220 : vector<16x32xf32>
    %222 = vector.broadcast %200 : vector<1x32xf32> to vector<16x32xf32>
    %223 = arith.mulf %221, %222 : vector<16x32xf32>
    %224 = vector.broadcast %201 : vector<1x32xf32> to vector<16x32xf32>
    %225 = arith.addf %223, %224 : vector<16x32xf32>
    %cst_69 = arith.constant dense<0.000000e+00> : vector<16x96xf32>
    %226 = tpu.matmul %225, %54, %cst_69 {dimension_numbers = #tpu.dot_dimension_numbers<[1], [0], [0], [1], [0, 0, 1, 1], [], []>} : vector<16x32xf32>, vector<32x96xf32>, vector<16x96xf32> -> vector<16x96xf32>
    %227 = vector.broadcast %55 : vector<1x96xf32> to vector<16x96xf32>
    %228 = arith.addf %226, %227 : vector<16x96xf32>
    %229 = vector.extract_strided_slice %228 {offsets = [0, 0], sizes = [16, 8], strides = [1, 1]} : vector<16x96xf32> to vector<16x8xf32>
    %230 = vector.shape_cast %229 : vector<16x8xf32> to vector<2x8x8xf32>
    %231 = vector.extract_strided_slice %228 {offsets = [0, 32], sizes = [16, 8], strides = [1, 1]} : vector<16x96xf32> to vector<16x8xf32>
    %232 = vector.shape_cast %231 : vector<16x8xf32> to vector<2x8x8xf32>
    %233 = vector.extract_strided_slice %228 {offsets = [0, 64], sizes = [16, 8], strides = [1, 1]} : vector<16x96xf32> to vector<16x8xf32>
    %234 = vector.shape_cast %233 : vector<16x8xf32> to vector<2x8x8xf32>
    "tpu.trace_start"() <{level = 10 : i32, message = "bqd,bkd->bqk"}> : () -> ()
    %cst_70 = arith.constant dense<0.000000e+00> : vector<2x8x8xf32>
    %235 = tpu.matmul %230, %232, %cst_70 {dimension_numbers = #tpu.dot_dimension_numbers<[2], [2], [1], [1], [0, 0, 0, 1, 1, 1], [0], [0]>} : vector<2x8x8xf32>, vector<2x8x8xf32>, vector<2x8x8xf32> -> vector<2x8x8xf32>
    "tpu.trace_stop"() : () -> ()
    %236 = vector.broadcast %53 : vector<2x1x8xf32> to vector<2x8x8xf32>
    %237 = arith.addf %235, %236 : vector<2x8x8xf32>
    %cst_71 = arith.constant dense<0xFF800000> : vector<2x8xf32>
    %238 = vector.multi_reduction <maximumf>, %237, %cst_71 [2] : vector<2x8x8xf32> to vector<2x8xf32>
    %239 = vector.shape_cast %238 : vector<2x8xf32> to vector<2x8x1xf32>
    %240 = vector.broadcast %239 : vector<2x8x1xf32> to vector<2x8x8xf32>
    %241 = arith.subf %237, %240 : vector<2x8x8xf32>
    %242 = math.exp %241 : vector<2x8x8xf32>
    %cst_72 = arith.constant dense<0.000000e+00> : vector<2x8xf32>
    %243 = vector.multi_reduction <add>, %242, %cst_72 [2] : vector<2x8x8xf32> to vector<2x8xf32>
    %244 = vector.shape_cast %243 : vector<2x8xf32> to vector<2x8x1xf32>
    "tpu.trace_start"() <{level = 10 : i32, message = "bqk,bkd->bqd"}> : () -> ()
    %cst_73 = arith.constant dense<0.000000e+00> : vector<2x8x8xf32>
    %245 = tpu.matmul %242, %234, %cst_73 {dimension_numbers = #tpu.dot_dimension_numbers<[2], [1], [1], [2], [0, 0, 0, 1, 1, 2], [0], [0]>} : vector<2x8x8xf32>, vector<2x8x8xf32>, vector<2x8x8xf32> -> vector<2x8x8xf32>
    "tpu.trace_stop"() : () -> ()
    %246 = tpu.reciprocal %244 {approx = true} : vector<2x8x1xf32> -> vector<2x8x1xf32>
    %247 = vector.broadcast %246 : vector<2x8x1xf32> to vector<2x8x8xf32>
    %248 = arith.mulf %245, %247 : vector<2x8x8xf32>
    %249 = vector.shape_cast %248 : vector<2x8x8xf32> to vector<16x8xf32>
    %250 = vector.extract_strided_slice %228 {offsets = [0, 8], sizes = [16, 8], strides = [1, 1]} : vector<16x96xf32> to vector<16x8xf32>
    %251 = vector.shape_cast %250 : vector<16x8xf32> to vector<2x8x8xf32>
    %252 = vector.extract_strided_slice %228 {offsets = [0, 40], sizes = [16, 8], strides = [1, 1]} : vector<16x96xf32> to vector<16x8xf32>
    %253 = vector.shape_cast %252 : vector<16x8xf32> to vector<2x8x8xf32>
    %254 = vector.extract_strided_slice %228 {offsets = [0, 72], sizes = [16, 8], strides = [1, 1]} : vector<16x96xf32> to vector<16x8xf32>
    %255 = vector.shape_cast %254 : vector<16x8xf32> to vector<2x8x8xf32>
    "tpu.trace_start"() <{level = 10 : i32, message = "bqd,bkd->bqk"}> : () -> ()
    %cst_74 = arith.constant dense<0.000000e+00> : vector<2x8x8xf32>
    %256 = tpu.matmul %251, %253, %cst_74 {dimension_numbers = #tpu.dot_dimension_numbers<[2], [2], [1], [1], [0, 0, 0, 1, 1, 1], [0], [0]>} : vector<2x8x8xf32>, vector<2x8x8xf32>, vector<2x8x8xf32> -> vector<2x8x8xf32>
    "tpu.trace_stop"() : () -> ()
    %257 = vector.broadcast %53 : vector<2x1x8xf32> to vector<2x8x8xf32>
    %258 = arith.addf %256, %257 : vector<2x8x8xf32>
    %cst_75 = arith.constant dense<0xFF800000> : vector<2x8xf32>
    %259 = vector.multi_reduction <maximumf>, %258, %cst_75 [2] : vector<2x8x8xf32> to vector<2x8xf32>
    %260 = vector.shape_cast %259 : vector<2x8xf32> to vector<2x8x1xf32>
    %261 = vector.broadcast %260 : vector<2x8x1xf32> to vector<2x8x8xf32>
    %262 = arith.subf %258, %261 : vector<2x8x8xf32>
    %263 = math.exp %262 : vector<2x8x8xf32>
    %cst_76 = arith.constant dense<0.000000e+00> : vector<2x8xf32>
    %264 = vector.multi_reduction <add>, %263, %cst_76 [2] : vector<2x8x8xf32> to vector<2x8xf32>
    %265 = vector.shape_cast %264 : vector<2x8xf32> to vector<2x8x1xf32>
    "tpu.trace_start"() <{level = 10 : i32, message = "bqk,bkd->bqd"}> : () -> ()
    %cst_77 = arith.constant dense<0.000000e+00> : vector<2x8x8xf32>
    %266 = tpu.matmul %263, %255, %cst_77 {dimension_numbers = #tpu.dot_dimension_numbers<[2], [1], [1], [2], [0, 0, 0, 1, 1, 2], [0], [0]>} : vector<2x8x8xf32>, vector<2x8x8xf32>, vector<2x8x8xf32> -> vector<2x8x8xf32>
    "tpu.trace_stop"() : () -> ()
    %267 = tpu.reciprocal %265 {approx = true} : vector<2x8x1xf32> -> vector<2x8x1xf32>
    %268 = vector.broadcast %267 : vector<2x8x1xf32> to vector<2x8x8xf32>
    %269 = arith.mulf %266, %268 : vector<2x8x8xf32>
    %270 = vector.shape_cast %269 : vector<2x8x8xf32> to vector<16x8xf32>
    %271 = vector.extract_strided_slice %228 {offsets = [0, 16], sizes = [16, 8], strides = [1, 1]} : vector<16x96xf32> to vector<16x8xf32>
    %272 = vector.shape_cast %271 : vector<16x8xf32> to vector<2x8x8xf32>
    %273 = vector.extract_strided_slice %228 {offsets = [0, 48], sizes = [16, 8], strides = [1, 1]} : vector<16x96xf32> to vector<16x8xf32>
    %274 = vector.shape_cast %273 : vector<16x8xf32> to vector<2x8x8xf32>
    %275 = vector.extract_strided_slice %228 {offsets = [0, 80], sizes = [16, 8], strides = [1, 1]} : vector<16x96xf32> to vector<16x8xf32>
    %276 = vector.shape_cast %275 : vector<16x8xf32> to vector<2x8x8xf32>
    "tpu.trace_start"() <{level = 10 : i32, message = "bqd,bkd->bqk"}> : () -> ()
    %cst_78 = arith.constant dense<0.000000e+00> : vector<2x8x8xf32>
    %277 = tpu.matmul %272, %274, %cst_78 {dimension_numbers = #tpu.dot_dimension_numbers<[2], [2], [1], [1], [0, 0, 0, 1, 1, 1], [0], [0]>} : vector<2x8x8xf32>, vector<2x8x8xf32>, vector<2x8x8xf32> -> vector<2x8x8xf32>
    "tpu.trace_stop"() : () -> ()
    %278 = vector.broadcast %53 : vector<2x1x8xf32> to vector<2x8x8xf32>
    %279 = arith.addf %277, %278 : vector<2x8x8xf32>
    %cst_79 = arith.constant dense<0xFF800000> : vector<2x8xf32>
    %280 = vector.multi_reduction <maximumf>, %279, %cst_79 [2] : vector<2x8x8xf32> to vector<2x8xf32>
    %281 = vector.shape_cast %280 : vector<2x8xf32> to vector<2x8x1xf32>
    %282 = vector.broadcast %281 : vector<2x8x1xf32> to vector<2x8x8xf32>
    %283 = arith.subf %279, %282 : vector<2x8x8xf32>
    %284 = math.exp %283 : vector<2x8x8xf32>
    %cst_80 = arith.constant dense<0.000000e+00> : vector<2x8xf32>
    %285 = vector.multi_reduction <add>, %284, %cst_80 [2] : vector<2x8x8xf32> to vector<2x8xf32>
    %286 = vector.shape_cast %285 : vector<2x8xf32> to vector<2x8x1xf32>
    "tpu.trace_start"() <{level = 10 : i32, message = "bqk,bkd->bqd"}> : () -> ()
    %cst_81 = arith.constant dense<0.000000e+00> : vector<2x8x8xf32>
    %287 = tpu.matmul %284, %276, %cst_81 {dimension_numbers = #tpu.dot_dimension_numbers<[2], [1], [1], [2], [0, 0, 0, 1, 1, 2], [0], [0]>} : vector<2x8x8xf32>, vector<2x8x8xf32>, vector<2x8x8xf32> -> vector<2x8x8xf32>
    "tpu.trace_stop"() : () -> ()
    %288 = tpu.reciprocal %286 {approx = true} : vector<2x8x1xf32> -> vector<2x8x1xf32>
    %289 = vector.broadcast %288 : vector<2x8x1xf32> to vector<2x8x8xf32>
    %290 = arith.mulf %287, %289 : vector<2x8x8xf32>
    %291 = vector.shape_cast %290 : vector<2x8x8xf32> to vector<16x8xf32>
    %292 = vector.extract_strided_slice %228 {offsets = [0, 24], sizes = [16, 8], strides = [1, 1]} : vector<16x96xf32> to vector<16x8xf32>
    %293 = vector.shape_cast %292 : vector<16x8xf32> to vector<2x8x8xf32>
    %294 = vector.extract_strided_slice %228 {offsets = [0, 56], sizes = [16, 8], strides = [1, 1]} : vector<16x96xf32> to vector<16x8xf32>
    %295 = vector.shape_cast %294 : vector<16x8xf32> to vector<2x8x8xf32>
    %296 = vector.extract_strided_slice %228 {offsets = [0, 88], sizes = [16, 8], strides = [1, 1]} : vector<16x96xf32> to vector<16x8xf32>
    %297 = vector.shape_cast %296 : vector<16x8xf32> to vector<2x8x8xf32>
    "tpu.trace_start"() <{level = 10 : i32, message = "bqd,bkd->bqk"}> : () -> ()
    %cst_82 = arith.constant dense<0.000000e+00> : vector<2x8x8xf32>
    %298 = tpu.matmul %293, %295, %cst_82 {dimension_numbers = #tpu.dot_dimension_numbers<[2], [2], [1], [1], [0, 0, 0, 1, 1, 1], [0], [0]>} : vector<2x8x8xf32>, vector<2x8x8xf32>, vector<2x8x8xf32> -> vector<2x8x8xf32>
    "tpu.trace_stop"() : () -> ()
    %299 = vector.broadcast %53 : vector<2x1x8xf32> to vector<2x8x8xf32>
    %300 = arith.addf %298, %299 : vector<2x8x8xf32>
    %cst_83 = arith.constant dense<0xFF800000> : vector<2x8xf32>
    %301 = vector.multi_reduction <maximumf>, %300, %cst_83 [2] : vector<2x8x8xf32> to vector<2x8xf32>
    %302 = vector.shape_cast %301 : vector<2x8xf32> to vector<2x8x1xf32>
    %303 = vector.broadcast %302 : vector<2x8x1xf32> to vector<2x8x8xf32>
    %304 = arith.subf %300, %303 : vector<2x8x8xf32>
    %305 = math.exp %304 : vector<2x8x8xf32>
    %cst_84 = arith.constant dense<0.000000e+00> : vector<2x8xf32>
    %306 = vector.multi_reduction <add>, %305, %cst_84 [2] : vector<2x8x8xf32> to vector<2x8xf32>
    %307 = vector.shape_cast %306 : vector<2x8xf32> to vector<2x8x1xf32>
    "tpu.trace_start"() <{level = 10 : i32, message = "bqk,bkd->bqd"}> : () -> ()
    %cst_85 = arith.constant dense<0.000000e+00> : vector<2x8x8xf32>
    %308 = tpu.matmul %305, %297, %cst_85 {dimension_numbers = #tpu.dot_dimension_numbers<[2], [1], [1], [2], [0, 0, 0, 1, 1, 2], [0], [0]>} : vector<2x8x8xf32>, vector<2x8x8xf32>, vector<2x8x8xf32> -> vector<2x8x8xf32>
    "tpu.trace_stop"() : () -> ()
    %309 = tpu.reciprocal %307 {approx = true} : vector<2x8x1xf32> -> vector<2x8x1xf32>
    %310 = vector.broadcast %309 : vector<2x8x1xf32> to vector<2x8x8xf32>
    %311 = arith.mulf %308, %310 : vector<2x8x8xf32>
    %312 = vector.shape_cast %311 : vector<2x8x8xf32> to vector<16x8xf32>
    %313 = tpu.concatenate %249, %270, %291, %312 in 1 : vector<16x8xf32>, vector<16x8xf32>, vector<16x8xf32>, vector<16x8xf32> -> vector<16x32xf32>
    %cst_86 = arith.constant dense<0.000000e+00> : vector<16x32xf32>
    %314 = tpu.matmul %313, %56, %cst_86 {dimension_numbers = #tpu.dot_dimension_numbers<[1], [0], [0], [1], [0, 0, 1, 1], [], []>} : vector<16x32xf32>, vector<32x32xf32>, vector<16x32xf32> -> vector<16x32xf32>
    %315 = vector.broadcast %57 : vector<1x32xf32> to vector<16x32xf32>
    %316 = arith.addf %314, %315 : vector<16x32xf32>
    %317 = arith.addf %225, %316 : vector<16x32xf32>
    %c23_87 = arith.constant 23 : index
    %c0_88 = arith.constant 0 : index
    %318 = vector.load %arg2[%c23_87, %c0_88] : memref<35x128xf32, #tpu.memory_space<vmem>>, vector<1x32xf32>
    %c24_89 = arith.constant 24 : index
    %c0_90 = arith.constant 0 : index
    %319 = vector.load %arg2[%c24_89, %c0_90] : memref<35x128xf32, #tpu.memory_space<vmem>>, vector<1x32xf32>
    %cst_91 = arith.constant dense<0.000000e+00> : vector<16xf32>
    %320 = vector.multi_reduction <add>, %317, %cst_91 [1] : vector<16x32xf32> to vector<16xf32>
    %321 = vector.shape_cast %320 : vector<16xf32> to vector<16x1xf32>
    %322 = arith.mulf %317, %317 : vector<16x32xf32>
    %cst_92 = arith.constant dense<0.000000e+00> : vector<16xf32>
    %323 = vector.multi_reduction <add>, %322, %cst_92 [1] : vector<16x32xf32> to vector<16xf32>
    %324 = vector.shape_cast %323 : vector<16xf32> to vector<16x1xf32>
    %cst_93 = arith.constant 3.125000e-02 : f32
    %325 = vector.broadcast %cst_93 : f32 to vector<16x1xf32>
    %326 = arith.mulf %321, %325 : vector<16x1xf32>
    %cst_94 = arith.constant 3.125000e-02 : f32
    %327 = vector.broadcast %cst_94 : f32 to vector<16x1xf32>
    %328 = arith.mulf %324, %327 : vector<16x1xf32>
    %329 = arith.mulf %326, %326 : vector<16x1xf32>
    %330 = arith.subf %328, %329 : vector<16x1xf32>
    %cst_95 = arith.constant 0.000000e+00 : f32
    %331 = vector.broadcast %cst_95 : f32 to vector<16x1xf32>
    %332 = arith.maximumf %330, %331 : vector<16x1xf32>
    %333 = vector.broadcast %326 : vector<16x1xf32> to vector<16x32xf32>
    %334 = arith.subf %317, %333 : vector<16x32xf32>
    %cst_96 = arith.constant 9.99999996E-13 : f32
    %335 = vector.broadcast %cst_96 : f32 to vector<16x1xf32>
    %336 = arith.addf %332, %335 : vector<16x1xf32>
    %337 = math.rsqrt %336 : vector<16x1xf32>
    %338 = vector.broadcast %337 : vector<16x1xf32> to vector<16x32xf32>
    %339 = arith.mulf %334, %338 : vector<16x32xf32>
    %340 = vector.broadcast %318 : vector<1x32xf32> to vector<16x32xf32>
    %341 = arith.mulf %339, %340 : vector<16x32xf32>
    %342 = vector.broadcast %319 : vector<1x32xf32> to vector<16x32xf32>
    %343 = arith.addf %341, %342 : vector<16x32xf32>
    %cst_97 = arith.constant dense<0.000000e+00> : vector<16x64xf32>
    %344 = tpu.matmul %343, %58, %cst_97 {dimension_numbers = #tpu.dot_dimension_numbers<[1], [0], [0], [1], [0, 0, 1, 1], [], []>} : vector<16x32xf32>, vector<32x64xf32>, vector<16x64xf32> -> vector<16x64xf32>
    %345 = vector.broadcast %59 : vector<1x64xf32> to vector<16x64xf32>
    %346 = arith.addf %344, %345 : vector<16x64xf32>
    %347 = arith.mulf %346, %346 : vector<16x64xf32>
    %348 = arith.mulf %346, %347 : vector<16x64xf32>
    %cst_98 = arith.constant 4.471500e-02 : f32
    %349 = vector.broadcast %cst_98 : f32 to vector<16x64xf32>
    %350 = arith.mulf %349, %348 : vector<16x64xf32>
    %351 = arith.addf %346, %350 : vector<16x64xf32>
    %cst_99 = arith.constant 0.797884583 : f32
    %352 = vector.broadcast %cst_99 : f32 to vector<16x64xf32>
    %353 = arith.mulf %352, %351 : vector<16x64xf32>
    %354 = math.tanh %353 : vector<16x64xf32>
    %cst_100 = arith.constant 1.000000e+00 : f32
    %355 = vector.broadcast %cst_100 : f32 to vector<16x64xf32>
    %356 = arith.addf %355, %354 : vector<16x64xf32>
    %cst_101 = arith.constant 5.000000e-01 : f32
    %357 = vector.broadcast %cst_101 : f32 to vector<16x64xf32>
    %358 = arith.mulf %357, %356 : vector<16x64xf32>
    %359 = arith.mulf %346, %358 : vector<16x64xf32>
    %cst_102 = arith.constant dense<0.000000e+00> : vector<16x32xf32>
    %360 = tpu.matmul %359, %60, %cst_102 {dimension_numbers = #tpu.dot_dimension_numbers<[1], [0], [0], [1], [0, 0, 1, 1], [], []>} : vector<16x64xf32>, vector<64x32xf32>, vector<16x32xf32> -> vector<16x32xf32>
    %361 = vector.broadcast %61 : vector<1x32xf32> to vector<16x32xf32>
    %362 = arith.addf %360, %361 : vector<16x32xf32>
    %363 = arith.addf %343, %362 : vector<16x32xf32>
    %c27_103 = arith.constant 27 : index
    %c0_104 = arith.constant 0 : index
    %364 = vector.load %arg2[%c27_103, %c0_104] : memref<35x128xf32, #tpu.memory_space<vmem>>, vector<1x32xf32>
    %c28_105 = arith.constant 28 : index
    %c0_106 = arith.constant 0 : index
    %365 = vector.load %arg2[%c28_105, %c0_106] : memref<35x128xf32, #tpu.memory_space<vmem>>, vector<1x32xf32>
    %cst_107 = arith.constant dense<0.000000e+00> : vector<16xf32>
    %366 = vector.multi_reduction <add>, %363, %cst_107 [1] : vector<16x32xf32> to vector<16xf32>
    %367 = vector.shape_cast %366 : vector<16xf32> to vector<16x1xf32>
    %368 = arith.mulf %363, %363 : vector<16x32xf32>
    %cst_108 = arith.constant dense<0.000000e+00> : vector<16xf32>
    %369 = vector.multi_reduction <add>, %368, %cst_108 [1] : vector<16x32xf32> to vector<16xf32>
    %370 = vector.shape_cast %369 : vector<16xf32> to vector<16x1xf32>
    %cst_109 = arith.constant 3.125000e-02 : f32
    %371 = vector.broadcast %cst_109 : f32 to vector<16x1xf32>
    %372 = arith.mulf %367, %371 : vector<16x1xf32>
    %cst_110 = arith.constant 3.125000e-02 : f32
    %373 = vector.broadcast %cst_110 : f32 to vector<16x1xf32>
    %374 = arith.mulf %370, %373 : vector<16x1xf32>
    %375 = arith.mulf %372, %372 : vector<16x1xf32>
    %376 = arith.subf %374, %375 : vector<16x1xf32>
    %cst_111 = arith.constant 0.000000e+00 : f32
    %377 = vector.broadcast %cst_111 : f32 to vector<16x1xf32>
    %378 = arith.maximumf %376, %377 : vector<16x1xf32>
    %379 = vector.broadcast %372 : vector<16x1xf32> to vector<16x32xf32>
    %380 = arith.subf %363, %379 : vector<16x32xf32>
    %cst_112 = arith.constant 9.99999996E-13 : f32
    %381 = vector.broadcast %cst_112 : f32 to vector<16x1xf32>
    %382 = arith.addf %378, %381 : vector<16x1xf32>
    %383 = math.rsqrt %382 : vector<16x1xf32>
    %384 = vector.broadcast %383 : vector<16x1xf32> to vector<16x32xf32>
    %385 = arith.mulf %380, %384 : vector<16x32xf32>
    %386 = vector.broadcast %364 : vector<1x32xf32> to vector<16x32xf32>
    %387 = arith.mulf %385, %386 : vector<16x32xf32>
    %388 = vector.broadcast %365 : vector<1x32xf32> to vector<16x32xf32>
    %389 = arith.addf %387, %388 : vector<16x32xf32>
    %c304 = arith.constant 304 : index
    %c0_113 = arith.constant 0 : index
    %390 = vector.load %arg3[%c304, %c0_113] : memref<416x128xf32, #tpu.memory_space<vmem>>, vector<32x16xf32>
    %c29 = arith.constant 29 : index
    %c0_114 = arith.constant 0 : index
    %391 = vector.load %arg2[%c29, %c0_114] : memref<35x128xf32, #tpu.memory_space<vmem>>, vector<1x16xf32>
    %cst_115 = arith.constant dense<0.000000e+00> : vector<16x16xf32>
    %392 = tpu.matmul %389, %390, %cst_115 {dimension_numbers = #tpu.dot_dimension_numbers<[1], [0], [0], [1], [0, 0, 1, 1], [], []>} : vector<16x32xf32>, vector<32x16xf32>, vector<16x16xf32> -> vector<16x16xf32>
    %393 = vector.broadcast %391 : vector<1x16xf32> to vector<16x16xf32>
    %394 = arith.addf %392, %393 : vector<16x16xf32>
    %395 = arith.mulf %394, %394 : vector<16x16xf32>
    %396 = arith.mulf %394, %395 : vector<16x16xf32>
    %cst_116 = arith.constant 4.471500e-02 : f32
    %397 = vector.broadcast %cst_116 : f32 to vector<16x16xf32>
    %398 = arith.mulf %397, %396 : vector<16x16xf32>
    %399 = arith.addf %394, %398 : vector<16x16xf32>
    %cst_117 = arith.constant 0.797884583 : f32
    %400 = vector.broadcast %cst_117 : f32 to vector<16x16xf32>
    %401 = arith.mulf %400, %399 : vector<16x16xf32>
    %402 = math.tanh %401 : vector<16x16xf32>
    %cst_118 = arith.constant 1.000000e+00 : f32
    %403 = vector.broadcast %cst_118 : f32 to vector<16x16xf32>
    %404 = arith.addf %403, %402 : vector<16x16xf32>
    %cst_119 = arith.constant 5.000000e-01 : f32
    %405 = vector.broadcast %cst_119 : f32 to vector<16x16xf32>
    %406 = arith.mulf %405, %404 : vector<16x16xf32>
    %407 = arith.mulf %394, %406 : vector<16x16xf32>
    %c30 = arith.constant 30 : index
    %c0_120 = arith.constant 0 : index
    %408 = vector.load %arg2[%c30, %c0_120] : memref<35x128xf32, #tpu.memory_space<vmem>>, vector<1x16xf32>
    %c31 = arith.constant 31 : index
    %c0_121 = arith.constant 0 : index
    %409 = vector.load %arg2[%c31, %c0_121] : memref<35x128xf32, #tpu.memory_space<vmem>>, vector<1x16xf32>
    %cst_122 = arith.constant dense<0.000000e+00> : vector<16xf32>
    %410 = vector.multi_reduction <add>, %407, %cst_122 [1] : vector<16x16xf32> to vector<16xf32>
    %411 = vector.shape_cast %410 : vector<16xf32> to vector<16x1xf32>
    %412 = arith.mulf %407, %407 : vector<16x16xf32>
    %cst_123 = arith.constant dense<0.000000e+00> : vector<16xf32>
    %413 = vector.multi_reduction <add>, %412, %cst_123 [1] : vector<16x16xf32> to vector<16xf32>
    %414 = vector.shape_cast %413 : vector<16xf32> to vector<16x1xf32>
    %cst_124 = arith.constant 6.250000e-02 : f32
    %415 = vector.broadcast %cst_124 : f32 to vector<16x1xf32>
    %416 = arith.mulf %411, %415 : vector<16x1xf32>
    %cst_125 = arith.constant 6.250000e-02 : f32
    %417 = vector.broadcast %cst_125 : f32 to vector<16x1xf32>
    %418 = arith.mulf %414, %417 : vector<16x1xf32>
    %419 = arith.mulf %416, %416 : vector<16x1xf32>
    %420 = arith.subf %418, %419 : vector<16x1xf32>
    %cst_126 = arith.constant 0.000000e+00 : f32
    %421 = vector.broadcast %cst_126 : f32 to vector<16x1xf32>
    %422 = arith.maximumf %420, %421 : vector<16x1xf32>
    %423 = vector.broadcast %416 : vector<16x1xf32> to vector<16x16xf32>
    %424 = arith.subf %407, %423 : vector<16x16xf32>
    %cst_127 = arith.constant 9.99999996E-13 : f32
    %425 = vector.broadcast %cst_127 : f32 to vector<16x1xf32>
    %426 = arith.addf %422, %425 : vector<16x1xf32>
    %427 = math.rsqrt %426 : vector<16x1xf32>
    %428 = vector.broadcast %427 : vector<16x1xf32> to vector<16x16xf32>
    %429 = arith.mulf %424, %428 : vector<16x16xf32>
    %430 = vector.broadcast %408 : vector<1x16xf32> to vector<16x16xf32>
    %431 = arith.mulf %429, %430 : vector<16x16xf32>
    %432 = vector.broadcast %409 : vector<1x16xf32> to vector<16x16xf32>
    %433 = arith.addf %431, %432 : vector<16x16xf32>
    %c336 = arith.constant 336 : index
    %c0_128 = arith.constant 0 : index
    %434 = vector.load %arg3[%c336, %c0_128] : memref<416x128xf32, #tpu.memory_space<vmem>>, vector<16x128xf32>
    %c32 = arith.constant 32 : index
    %c0_129 = arith.constant 0 : index
    %435 = vector.load %arg2[%c32, %c0_129] : memref<35x128xf32, #tpu.memory_space<vmem>>, vector<1x128xf32>
    %cst_130 = arith.constant dense<0.000000e+00> : vector<16x128xf32>
    %436 = tpu.matmul %433, %434, %cst_130 {dimension_numbers = #tpu.dot_dimension_numbers<[1], [0], [0], [1], [0, 0, 1, 1], [], []>} : vector<16x16xf32>, vector<16x128xf32>, vector<16x128xf32> -> vector<16x128xf32>
    %437 = vector.broadcast %435 : vector<1x128xf32> to vector<16x128xf32>
    %438 = arith.addf %436, %437 : vector<16x128xf32>
    %c0_131 = arith.constant 0 : index
    %c0_132 = arith.constant 0 : index
    %439 = vector.load %arg4[%c0_131, %c0_132] : memref<16x128xf32, #tpu.memory_space<vmem>>, vector<16x128xf32>
    tpu.vector_store %arg4[%c0_131, %c0_132], %438 {strides = array<i32>} : memref<16x128xf32, #tpu.memory_space<vmem>>, vector<16x128xf32>,
    %440 = vector.shape_cast %225 : vector<16x32xf32> to vector<2x8x32xf32>
    %441 = vector.extract_strided_slice %440 {offsets = [0, 0, 0], sizes = [2, 1, 32], strides = [1, 1, 1]} : vector<2x8x32xf32> to vector<2x1x32xf32>
    %442 = vector.shape_cast %441 : vector<2x1x32xf32> to vector<2x32xf32>
    %c352 = arith.constant 352 : index
    %c0_133 = arith.constant 0 : index
    %443 = vector.load %arg3[%c352, %c0_133] : memref<416x128xf32, #tpu.memory_space<vmem>>, vector<32x32xf32>
    %c33 = arith.constant 33 : index
    %c0_134 = arith.constant 0 : index
    %444 = vector.load %arg2[%c33, %c0_134] : memref<35x128xf32, #tpu.memory_space<vmem>>, vector<1x32xf32>
    %c384 = arith.constant 384 : index
    %c0_135 = arith.constant 0 : index
    %445 = vector.load %arg3[%c384, %c0_135] : memref<416x128xf32, #tpu.memory_space<vmem>>, vector<32x128xf32>
    %c34 = arith.constant 34 : index
    %c0_136 = arith.constant 0 : index
    %446 = vector.load %arg2[%c34, %c0_136] : memref<35x128xf32, #tpu.memory_space<vmem>>, vector<1x128xf32>
    %cst_137 = arith.constant dense<0.000000e+00> : vector<2x32xf32>
    %447 = tpu.matmul %442, %443, %cst_137 {dimension_numbers = #tpu.dot_dimension_numbers<[1], [0], [0], [1], [0, 0, 1, 1], [], []>} : vector<2x32xf32>, vector<32x32xf32>, vector<2x32xf32> -> vector<2x32xf32>
    %448 = vector.broadcast %444 : vector<1x32xf32> to vector<2x32xf32>
    %449 = arith.addf %447, %448 : vector<2x32xf32>
    %cst_138 = arith.constant 0.000000e+00 : f32
    %450 = vector.broadcast %cst_138 : f32 to vector<2x32xf32>
    %451 = arith.maximumf %449, %450 : vector<2x32xf32>
    %cst_139 = arith.constant dense<0.000000e+00> : vector<2x128xf32>
    %452 = tpu.matmul %451, %445, %cst_139 {dimension_numbers = #tpu.dot_dimension_numbers<[1], [0], [0], [1], [0, 0, 1, 1], [], []>} : vector<2x32xf32>, vector<32x128xf32>, vector<2x128xf32> -> vector<2x128xf32>
    %453 = vector.broadcast %446 : vector<1x128xf32> to vector<2x128xf32>
    %454 = arith.addf %452, %453 : vector<2x128xf32>
    %c0_140 = arith.constant 0 : index
    %c0_141 = arith.constant 0 : index
    %455 = vector.load %arg5[%c0_140, %c0_141] : memref<2x128xf32, #tpu.memory_space<vmem>>, vector<2x128xf32>
    tpu.vector_store %arg5[%c0_140, %c0_141], %454 {strides = array<i32>} : memref<2x128xf32, #tpu.memory_space<vmem>>, vector<2x128xf32>,
    return
  }
}

</mosaic_0001>

<bundles_post_ra>
// kernel: forward.1
= control target key start
LH: loop header
LB: loop body
LE: loop exit
PB: predicated region body
PF: predicated region fallthrough
CT: control target
= control target key end

     0   :  { %11 = vsyncpa [#allocation3], 0  ;;  %s5880_s0 = inlined_call_operand.vmem [shape: s32[16,2], index: 0, kind: input, shape index: {}]   ;;  %s5881_s1 = inlined_call_operand.vmem [shape: f32[2,1,8], index: 1, kind: input, shape index: {}]   ;;  %s5882_s2 = inlined_call_operand.hbm [shape: f32[35,128], index: 2, kind: input, shape index: {}]   ;;  %s5883_s3 = inlined_call_operand.hbm [shape: f32[416,128], index: 3, kind: input, shape index: {}]   ;;  %s5884_s4 = inlined_call_operand.vmem [shape: f32[16,128], index: 4, kind: output, shape index: {0}]   ;;  %s5885_s5 = inlined_call_operand.vmem [shape: f32[2,128], index: 5, kind: output, shape index: {1}]  }
   0x1   :  { %12 = vsyncpa [#allocation5], 0  ;;  %s5150_s18 = smov [#allocation2]  }
   0x2   :  { %s22_s19 = sshll.u32 %s5150_s18, 4  ;;  %s23_s19 = int_to_ptr.vmem [resolvable:$true] %s22_s19 }
   0x3   :  { %s5114_s20 = scalar_lea.vmem %s23_s19, 640  ;;  %p5119_p1 = scmp.lt.s32.totalorder %s23_s19, %s23_s19 }
   0x4   :  { %p5115_p0 = scmp.ne.s32.totalorder %s23_s19, %s5114_s20  ;;  %p5120_p2 = scmp.lt.s32.totalorder %s5114_s20, %s5114_s20 }
   0x6   :  { %p5121_p3 = por %p5120_p2, %p5119_p1 }
   0x8   :  { %p5122_p4 = pnand %p5121_p3, %p5115_p0 }
   0xa   :  { %5125 = shalt.err (!%p5122_p4)
}
   0xb   :  { %s5151_s21 = smov 128   ;;  %s5152_s22 = smov 8  }
   0xc   :  { %28 = dma.hbm_to_vmem [thread:$0]  %s5882_s2, 640, %s23_s19, [#allocation3], %s5151_s21, %s5151_s21, %s5152_s22  }
   0xd   :  { %s5153_s25 = smov [#allocation4]  }
   0xe   :  { %s34_s26 = sshll.u32 %s5153_s25, 4  ;;  %s35_s26 = int_to_ptr.vmem [resolvable:$true] %s34_s26 }
   0xf   :  { %s5134_s27 = scalar_lea.vmem %s35_s26, 6656  ;;  %p5139_p6 = scmp.lt.s32.totalorder %s35_s26, %s35_s26 }
  0x10   :  { %p5135_p5 = scmp.ne.s32.totalorder %s35_s26, %s5134_s27  ;;  %p5140_p7 = scmp.lt.s32.totalorder %s5134_s27, %s5134_s27 }
  0x12   :  { %p5141_p8 = por %p5140_p7, %p5139_p6 }
  0x14   :  { %p5142_p9 = pnand %p5141_p8, %p5135_p5 }
  0x16   :  { %5145 = shalt.err (!%p5142_p9)
}
  0x17   :  { %40 = dma.hbm_to_vmem [thread:$0]  %s5883_s3, 6656, %s35_s26, [#allocation5], %s5151_s21, %s5151_s21, %s5152_s22  }
  0x18   :  { %5146 = dma.done.wait [#allocation3], 640  }
  0x19   :  { %5147 = vsyncadd [#allocation3], 4294966656 }
  0x1a   :  { %5148 = dma.done.wait [#allocation5], 6656  }
  0x1b   :  { %5149 = vsyncadd [#allocation5], 4294960640  ;;  %v5154_v0 = vmov 0   ;;  %v47_v1 = vld [vmem:[%s5880_s0] sm:$0xff]  ;;  %v79_v3 = vld [vmem:[#allocation4 + $0x70] sm:$0xff]  ;;  %v5155_v7 = vmov 1   ;;  %v51_v22 = vlaneseq }
  0x1c   :  { %5001 = vset.pattern.permute.xlu0 %v5154_v0  ;;  %v80_v2 = vld [vmem:[#allocation4 + $0x78] sm:$0xff]  ;;  %v48_v4 = vld [vmem:[%s5880_s0 + $0x8] sm:$0xff]  ;;  %v78_v5 = vld [vmem:[#allocation4 + $0x68] sm:$0xff]  ;;  %v49_v6 = vcvt.s32.f32 %v47_v1  ;;  %5002 = vset.pattern.permute.xlu1 %v5155_v7  ;;  %v5156_v25 = vmov 1.0   ;;  %vm187_vm2 = vcmask 130048   ;;  %vm350_vm3 = vcmask 261120  }
  0x1d   :  { %54 = vperm.xlu0 %5001, %v47_v1   ;;  %4633 = vmatprep.subr.mxu0 %v80_v2  ;;  %v50_v8 = vcvt.s32.f32 %v48_v4  ;;  %v77_v9 = vld [vmem:[#allocation4 + $0x60] sm:$0xff]  ;;  %v76_v10 = vld [vmem:[#allocation4 + $0x58] sm:$0xff]  ;;  %v75_v11 = vld [vmem:[#allocation4 + $0x50] sm:$0xff]  ;;  %v52_v23 = vand.u32 127, %v51_v22  ;;  %v161_v27 = vshrl.u32 %v51_v22, 7  ;;  %vm5158_vm4 = vmmov 0  }
  0x1e   :  { %4634 = vmatpush3.msra.mxu0 %v80_v2  ;;  %169 = vperm.xlu1 %5002, %v49_v6   ;;  %v74_v12 = vld [vmem:[#allocation4 + $0x48] sm:$0xff]  ;;  %v73_v13 = vld [vmem:[#allocation4 + $0x40] sm:$0xff]  ;;  %v72_v14 = vld [vmem:[#allocation4 + $0x38] sm:$0xff]  ;;  %s5159_s0 = smov 96   ;;  %s5160_s3 = smov 64   ;;  %vm447_vm5 = vcmask 64512  }
  0x1f   :  { %4635 = vmatprep.subr.mxu0 %v79_v3  ;;  %v71_v15 = vld [vmem:[#allocation4 + $0x30] sm:$0xff]  ;;  %v70_v16 = vld [vmem:[#allocation4 + $0x28] sm:$0xff]  ;;  %v69_v17 = vld [vmem:[#allocation4 + $0x20] sm:$0xff]  ;;  %v162_v31 = vsub.s32 0, %v161_v27  ;;  %s5161_s12 = smov 88   ;;  %s5162_s13 = smov 120  }
  0x20   :  { %4636 = vmatpush3.msra.mxu0 %v79_v3  ;;  %v68_v18 = vld [vmem:[#allocation4 + $0x18] sm:$0xff]  ;;  %v67_v19 = vld [vmem:[#allocation4 + $0x10] sm:$0xff]  ;;  %v66_v20 = vld [vmem:[#allocation4 + $0x8] sm:$0xff]  ;;  %s5163_s14 = smov 56   ;;  %s5164_s15 = smov 80   ;;  %vm1791_vm6 = vcmask 195584  }
  0x21   :  { %57 = vperm.xlu0 %5001, %v48_v4   ;;  %4637 = vmatprep.subr.mxu0 %v78_v5  ;;  %v65_v21 = vld [vmem:[#allocation4] sm:$0xff]  ;;  %v83_v28 = vld [vmem:[#allocation2 + $0x10] sm:$0x1]  ;;  %v84_v29 = vld [vmem:[#allocation2 + $0x11] sm:$0x1]  ;;  %s5165_s16 = smov 112  }
  0x22   :  { %4638 = vmatpush3.msra.mxu0 %v78_v5  ;;  %174 = vperm.xlu1 %5002, %v50_v8   ;;  %v166_v32 = vsub.f32 %v84_v29, %v83_v28  ;;  %v82_v34 = vld [vmem:[#allocation2 + $0x8] sm:$0xff]  ;;  %v163_v36 = vrot.slane %v83_v28, %v162_v31  ;;  %v81_v38 = vld [vmem:[#allocation2] sm:$0xff]  ;;  %v233_v54 = vld [vmem:[#allocation4 + $0x88] sm:$0xff]  ;;  %v5157_v29 = vmov 0.0   ;;  %s5166_s17 = smov 48   ;;  %s5167_s18 = smov 72  }
  0x23   :  { %4639 = vmatprep.subr.mxu0 %v77_v9  ;;  %4668 = vmatprep.subr.mxu1 %v233_v54  ;;  %v232_v55 = vld [vmem:[#allocation4 + $0x80] sm:$0xff]  ;;  %v5220_v56 = vld [vmem:[#allocation4 + $0xa8] sm:$0xff]  ;;  %v5230_v22 = vld [vmem:[#allocation4 + $0x98] sm:$0xff]  ;;  %s5168_s19 = smov 104   ;;  %s5169_s20 = smov 40   ;;  %vm2034_vm7 = vcmask 523264  }
  0x24   :  { %4640 = vmatpush3.msra.mxu0 %v77_v9  ;;  %v180_v33 = vrot.slane %v166_v32, %v162_v31  ;;  %4669 = vmatpush3.msra.mxu1 %v233_v54  ;;  %s5170_s21 = smov 16   ;;  %s5171_s23 = smov 24   ;;  %vm4209_vm8 = vcmask 1041409  }
  0x25   :  { %4641 = vmatprep.subr.mxu0 %v76_v10  ;;  %5003 = vset.pattern.permute.xlu0 %v5155_v7 }
  0x26   :  { %4642 = vmatpush3.msra.mxu0 %v76_v10  ;;  %4670 = vmatprep.subr.mxu1 %v232_v55 }
  0x27   :  { %4643 = vmatprep.subr.mxu0 %v75_v11  ;;  %4671 = vmatpush3.msra.mxu1 %v232_v55 }
  0x28   :  { %4644 = vmatpush3.msra.mxu0 %v75_v11  ;;  %4675 = vmatprep.subr.mxu1 %v5220_v56  ;;  %v4376_v11 = vld [vmem:[#allocation2 + $0x12] ss:$0 sm:$0xff] }
  0x29   :  { %4645 = vmatprep.subr.mxu0 %v74_v12 }
  0x2a   :  { %4646 = vmatpush3.msra.mxu0 %v74_v12 }
  0x2b   :  { %4647 = vmatprep.subr.mxu0 %v73_v13 }
  0x2c   :  { %4648 = vmatpush3.msra.mxu0 %v73_v13  ;;  %v4377_v13 = vld [vmem:[#allocation2 + $0x13] ss:$0 sm:$0xff] }
  0x2d   :  { %4649 = vmatprep.subr.mxu0 %v72_v14 }
  0x2e   :  { %4650 = vmatpush3.msra.mxu0 %v72_v14 }
  0x2f   :  { %4651 = vmatprep.subr.mxu0 %v71_v15 }
  0x30   :  { %4652 = vmatpush3.msra.mxu0 %v71_v15 }
  0x31   :  { %4653 = vmatprep.subr.mxu0 %v70_v16 }
  0x32   :  { %4654 = vmatpush3.msra.mxu0 %v70_v16 }
  0x33   :  { %4655 = vmatprep.subr.mxu0 %v69_v17 }
  0x34   :  { %4656 = vmatpush3.msra.mxu0 %v69_v17 }
  0x35   :  { %4657 = vmatprep.subr.mxu0 %v68_v18 }
  0x36   :  { %4658 = vmatpush3.msra.mxu0 %v68_v18 }
  0x37   :  { %4659 = vmatprep.subr.mxu0 %v67_v19 }
  0x38   :  { %4660 = vmatpush3.msra.mxu0 %v67_v19 }
  0x39   :  { %4661 = vmatprep.subr.mxu0 %v66_v20 }
  0x3a   :  { %4662 = vmatpush3.msra.mxu0 %v66_v20 }
  0x3b   :  { %4663 = vmatprep.subr.mxu0 %v65_v21 }
  0x3c   :  { %4664 = vmatpush3.msra.mxu0 %v65_v21  ;;  %v5226_v21 = vld [vmem:[#allocation4 + $0xa0] sm:$0xff] }
  0x3d   :  { %4711 = vmatprep.subr.mxu0 %v5157_v29 }
  0x98   :  { %v55_v24 = vpop.permute.xlu0 %54 }
  0x99   :  { %vm59_vm0 = vcmp.eq.s32.totalorder %v52_v23, %v55_v24  ;;  %v170_v30 = vpop.permute.xlu1 %169 }
  0x9a   :  { %4665 = vmatprep.mubr.msk.f32.mxu0 %vm59_vm0, %v5156_v25  ;;  %v181_v42 = vmul.f32 %v180_v33, %v170_v30  ;;  %v5252_v30 = vld [vmem:[#allocation2 + $0x15] ss:$0 sm:$0xff] }
  0x9c   :  { %v58_v26 = vpop.permute.xlu0 %57 }
  0x9d   :  { %vm60_vm1 = vcmp.eq.s32.totalorder %v52_v23, %v58_v26  ;;  %v175_v35 = vpop.permute.xlu1 %174  ;;  %v5234_v23 = vld [vmem:[#allocation4 + $0x90] sm:$0xff] }
  0x9e   :  { %4666 = vmatmul.mubr.msk.f32.vlgmr.msra.gmra.mxu0 %vm60_vm1, %v5156_v25  ;;  %v182_v40 = vmul.f32 %v180_v33, %v175_v35  ;;  %v4378_v25 = vld [vmem:[#allocation2 + $0x14] ss:$0 sm:$0xff] }
  0x9f   :  { %4713 = vmatprep.mubr.msk.f32.mxu0 %vm5158_vm4, %v5157_v29 }
 0x15e   :  { %v4667_v37 = vpop.f32.mrf.mxu0 }
 0x15f   :  { %v157_v39 = vadd.f32 %v4667_v37, %v82_v34 }
 0x160   :  { %v151_v41 = vpop.f32.mrf.mxu0 }
 0x161   :  { %v165_v43 = vadd.f32 %v163_v36, %v157_v39  ;;  %v152_v44 = vadd.f32 %v151_v41, %v81_v38  ;;  %v5282_v38 = vld [vmem:[%s5881_s1] ss:$0 sm:$0xff] }
 0x163   :  { %v164_v45 = vadd.f32 %v163_v36, %v152_v44  ;;  %v184_v46 = vadd.f32 %v182_v40, %v165_v43 }
 0x165   :  { %v183_v47 = vadd.f32 %v181_v42, %v164_v45  ;;  %v191_v48 = vsel %vm187_vm2, %v184_v46, 0.0  ;;  %v195_v52 = vmul.f32 %v184_v46, %v184_v46  ;;  %v5288_v42 = vld [vmem:[%s5881_s1 + $0x1] ss:$0 sm:$0xff] }
 0x166   :  { %192 = vadd.xlane.f32.xlu1 %v191_v48 }
 0x167   :  { %v188_v49 = vsel %vm187_vm2, %v183_v47, 0.0  ;;  %v194_v50 = vmul.f32 %v183_v47, %v183_v47  ;;  %v199_v53 = vsel %vm187_vm2, %v195_v52, 0.0 }
 0x168   :  { %189 = vadd.xlane.f32.xlu0 %v188_v49 }
 0x169   :  { %v196_v51 = vsel %vm187_vm2, %v194_v50, 0.0 }
 0x16c   :  { %197 = vadd.xlane.f32.xlu0 %v196_v51 }
 0x170   :  { %200 = vadd.xlane.f32.xlu0 %v199_v53 }
 0x1ef   :  { %v193_v59 = vpop.xlane.xlu1 %192 }
 0x1f0   :  { %v203_v61 = vmul.f32 0.0625, %v193_v59 }
 0x1f1   :  { %v190_v57 = vpop.xlane.xlu0 %189 }
 0x1f2   :  { %v202_v58 = vmul.f32 0.0625, %v190_v57  ;;  %v207_v2 = vmul.f32 %v203_v61, %v203_v61  ;;  %v213_v14 = vsub.f32 %v184_v46, %v203_v61 }
 0x1f4   :  { %v206_v62 = vmul.f32 %v202_v58, %v202_v58  ;;  %v212_v9 = vsub.f32 %v183_v47, %v202_v58 }
 0x1f5   :  { %v198_v60 = vpop.xlane.xlu0 %197 }
 0x1f6   :  { %v204_v63 = vmul.f32 0.0625, %v198_v60 }
 0x1f8   :  { %v208_v0 = vsub.f32 %v204_v63, %v206_v62 }
 0x1f9   :  { %v201_v1 = vpop.xlane.xlu0 %200 }
 0x1fa   :  { %v210_v3 = vmax.f32 %v208_v0, 0.0  ;;  %v205_v4 = vmul.f32 0.0625, %v201_v1 }
 0x1fc   :  { %v214_v5 = vadd.f32 1e-12, %v210_v3  ;;  %v209_v6 = vsub.f32 %v205_v4, %v207_v2 }
 0x1fe   :  { %5004 = vrsqrt.f32 %v214_v5  ;;  %v211_v7 = vmax.f32 %v209_v6, 0.0 }
 0x200   :  { %v215_v8 = vadd.f32 1e-12, %v211_v7 }
 0x202   :  { %5006 = vrsqrt.f32 %v215_v8 }
 0x20b   :  { %v5005_v10 = vpop.eup %5004 }
 0x20c   :  { %v218_v12 = vmul.f32 %v5005_v10, %v212_v9 }
 0x20e   :  { %v224_v15 = vmul.f32 %v4376_v11, %v218_v12 }
 0x20f   :  { %v5007_v16 = vpop.eup %5006 }
 0x210   :  { %v219_v17 = vmul.f32 %v5007_v16, %v213_v14  ;;  %v230_v18 = vadd.f32 %v4377_v13, %v224_v15 }
 0x212   :  { %v225_v19 = vmul.f32 %v4376_v11, %v219_v17  ;;  %4672 = vmatprep.mubr.msk.f32.mxu1 %vm187_vm2, %v230_v18 }
 0x214   :  { %v231_v20 = vadd.f32 %v4377_v13, %v225_v19 }
 0x216   :  { %4673 = vmatmul.mubr.msk.f32.vlgmr.msra.gmra.mxu1 %vm187_vm2, %v231_v20 }
 0x217   :  { %4676 = vmatpush3.msra.mxu1 %v5220_v56 }
 0x218   :  { %4677 = vmatprep.subr.mxu1 %v5226_v21 }
 0x219   :  { %4678 = vmatpush3.msra.mxu1 %v5226_v21 }
 0x21a   :  { %4679 = vmatprep.subr.mxu1 %v5230_v22 }
 0x21b   :  { %4680 = vmatpush3.msra.mxu1 %v5230_v22 }
 0x21c   :  { %4681 = vmatprep.subr.mxu1 %v5234_v23 }
 0x21d   :  { %4682 = vmatpush3.msra.mxu1 %v5234_v23 }
 0x21e   :  { %4686 = vmatprep.subr.mxu1 %v5157_v29 }
 0x2d6   :  { %v4674_v24 = vpop.f32.mrf.mxu1 }
 0x2d7   :  { %v5240_v28 = vadd.f32 %v4674_v24, %v4378_v25 }
 0x2d8   :  { %v311_v26 = vpop.f32.mrf.mxu1 }
 0x2d9   :  { %v5238_v27 = vadd.f32 %v4378_v25, %v311_v26 }
 0x2db   :  { %4683 = vmatprep.mubr.msk.f32.mxu1 %vm350_vm3, %v5238_v27 }
 0x2dc   :  { %4684 = vmatmul.mubr.msk.f32.vlgmr.msra.gmra.mxu1 %vm350_vm3, %v5240_v28 }
 0x2dd   :  { %4688 = vmatprep.mubr.msk.f32.mxu1 %vm5158_vm4, %v5157_v29 }
 0x39c   :  { %v4685_v31 = vpop.f32.mrf.mxu1 }
 0x39d   :  { %v5255_v32 = vadd.f32 %v4685_v31, %v5252_v30 }
 0x39e   :  { %v423_v33 = vpop.f32.mrf.mxu1 }
 0x39f   :  { %v5258_v34 = vadd.f32 %v5252_v30, %v423_v33  ;;  %523 = vrot.lane.b32.xlu0 %v5255_v32, %s5159_s0 }
 0x3a1   :  { %445 = vrot.lane.b32.xlu1 %v5258_v34, %s5159_s0 }
 0x3a5   :  { %617 = vrot.lane.b32.xlu1 %v5258_v34, %s5160_s3 }
 0x411   :  { %v524_v36 = vpop.permute.xlu0 %523 }
 0x413   :  { %v446_v35 = vpop.permute.xlu1 %445 }
 0x414   :  { %4687 = vmatpush3.xpose.msk.msra.mxu1 %vm447_vm5, %v446_v35 }
 0x415   :  { %4691 = vmatprep.subr.mxu1 %v5157_v29 }
 0x417   :  { %4689 = vmatmul.mubr.msk.f32.vlgmr.msra.gmra.mxu1 %vm447_vm5, %v5258_v34  ;;  %v618_v37 = vpop.permute.xlu1 %617 }
 0x418   :  { %4692 = vmatpush3.xpose.msk.msra.mxu1 %vm447_vm5, %v524_v36  ;;  %4693 = vmatprep.mubr.msk.f32.mxu1 %vm5158_vm4, %v5157_v29 }
 0x419   :  { %4696 = vmatprep.subr.mxu1 %v5157_v29 }
 0x41b   :  { %4694 = vmatmul.mubr.msk.f32.vlgmr.msra.gmra.mxu1 %vm447_vm5, %v5255_v32 }
 0x41c   :  { %4697 = vmatpush3.msra.mxu1 %v618_v37  ;;  %4698 = vmatprep.mubr.msk.f32.mxu1 %vm5158_vm4, %v5157_v29 }
 0x41d   :  { %4701 = vmatprep.subr.mxu1 %v5157_v29 }
 0x4d7   :  { %v518_v39 = vpop.f32.mrf.mxu1 }
 0x4d8   :  { %v519_v40 = vadd.f32 %v5282_v38, %v518_v39 }
 0x4d9   :  { %v4690_v41 = vpop.f32.mrf.mxu1 }
 0x4da   :  { %v599_v43 = vsel %vm447_vm5, %v519_v40, -inf }
 0x4db   :  { %600 = vmax.xlane.f32.xlu1 %v599_v43  ;;  %v595_v44 = vpop.f32.mrf.mxu1 }
 0x4dc   :  { %v596_v45 = vadd.f32 %v5288_v42, %v595_v44 }
 0x4dd   :  { %v4695_v46 = vpop.f32.mrf.mxu1 }
 0x4de   :  { %v602_v47 = vsel %vm447_vm5, %v596_v45, -inf }
 0x4df   :  { %603 = vmax.xlane.f32.xlu0 %v602_v47 }
 0x4ec   :  { %775 = vrot.lane.b32.xlu1 %v5258_v34, %s5161_s12 }
 0x4f0   :  { %853 = vrot.lane.b32.xlu1 %v5255_v32, %s5161_s12 }
 0x4f4   :  { %851 = vrot.lane.b32.xlu1 %v5255_v32, %s5162_s13 }
 0x4f5   :  { %693 = vrot.lane.b32.xlu0 %v5255_v32, %s5160_s3 }
 0x4f9   :  { %773 = vrot.lane.b32.xlu0 %v5258_v34, %s5162_s13 }
 0x4fd   :  { %947 = vrot.lane.b32.xlu0 %v5258_v34, %s5163_s14 }
 0x564   :  { %v601_v48 = vpop.xlane.xlu1 %600 }
 0x565   :  { %v605_v49 = vsub.f32 %v519_v40, %v601_v48 }
 0x567   :  { %v607_v50 = vmul.f32 1.442695, %v605_v49 }
 0x568   :  { %v604_v51 = vpop.xlane.xlu0 %603  ;;  %v776_v52 = vpop.permute.xlu1 %775 }
 0x569   :  { %5008 = vpow2.f32 %v607_v50  ;;  %v606_v53 = vsub.f32 %v596_v45, %v604_v51 }
 0x56b   :  { %v609_v54 = vmul.f32 1.442695, %v606_v53 }
 0x56c   :  { %v854_v55 = vpop.permute.xlu1 %853  ;;  %v694_v58 = vpop.permute.xlu0 %693 }
 0x56d   :  { %5010 = vpow2.f32 %v609_v54  ;;  %4712 = vmatpush3.xpose.msk.msra.mxu0 %vm447_vm5, %v854_v55 }
 0x56e   :  { %4721 = vmatprep.subr.mxu0 %v5157_v29 }
 0x570   :  { %v852_v57 = vpop.permute.xlu1 %851  ;;  %v774_v60 = vpop.permute.xlu0 %773 }
 0x571   :  { %4714 = vmatmul.mubr.msk.f32.vlgmr.msra.gmra.mxu0 %vm447_vm5, %v852_v57 }
 0x572   :  { %4723 = vmatprep.mubr.msk.f32.mxu0 %vm5158_vm4, %v5157_v29 }
 0x574   :  { %v948_v62 = vpop.permute.xlu0 %947 }
 0x576   :  { %v5310_v59 = vpop.eup %5008 }
 0x577   :  { %4699 = vmatmul.mubr.msk.f32.vlgmr.msra.gmra.mxu1 %vm447_vm5, %v5310_v59 }
 0x578   :  { %4702 = vmatpush3.msra.mxu1 %v694_v58  ;;  %4703 = vmatprep.mubr.msk.f32.mxu1 %vm5158_vm4, %v5157_v29 }
 0x579   :  { %4706 = vmatprep.subr.mxu1 %v5157_v29 }
 0x57a   :  { %v5317_v61 = vpop.eup %5010 }
 0x57b   :  { %4704 = vmatmul.mubr.msk.f32.vlgmr.msra.gmra.mxu1 %vm447_vm5, %v5317_v61 }
 0x57c   :  { %4707 = vmatpush3.xpose.msk.msra.mxu1 %vm447_vm5, %v776_v52  ;;  %4708 = vmatprep.mubr.msk.f32.mxu1 %vm5158_vm4, %v5157_v29 }
 0x57d   :  { %4716 = vmatprep.subr.mxu1 %v5157_v29 }
 0x57f   :  { %4709 = vmatmul.mubr.msk.f32.vlgmr.msra.gmra.mxu1 %vm447_vm5, %v774_v60 }
 0x580   :  { %4717 = vmatpush3.msra.mxu1 %v948_v62  ;;  %4718 = vmatprep.mubr.msk.f32.mxu1 %vm5158_vm4, %v5157_v29 }
 0x581   :  { %4726 = vmatprep.subr.mxu1 %v5157_v29 }
 0x631   :  { %v925_v63 = vpop.f32.mrf.mxu0 }
 0x632   :  { %v926_v0 = vadd.f32 %v5288_v42, %v925_v63 }
 0x633   :  { %v4715_v1 = vpop.f32.mrf.mxu0 }
 0x634   :  { %v932_v2 = vsel %vm447_vm5, %v926_v0, -inf }
 0x635   :  { %933 = vmax.xlane.f32.xlu1 %v932_v2 }
 0x637   :  { %v5331_v3 = vpop.f32.mrf.mxu1 }
 0x639   :  { %v4700_v4 = vpop.f32.mrf.mxu1 }
 0x63b   :  { %v5333_v5 = vpop.f32.mrf.mxu1 }
 0x63d   :  { %v4705_v6 = vpop.f32.mrf.mxu1 }
 0x63f   :  { %v847_v7 = vpop.f32.mrf.mxu1 }
 0x640   :  { %v848_v8 = vadd.f32 %v5282_v38, %v847_v7 }
 0x641   :  { %v4710_v9 = vpop.f32.mrf.mxu1 }
 0x642   :  { %v929_v10 = vsel %vm447_vm5, %v848_v8, -inf }
 0x643   :  { %930 = vmax.xlane.f32.xlu0 %v929_v10 }
 0x646   :  { %1023 = vrot.lane.b32.xlu1 %v5255_v32, %s5163_s14 }
 0x64a   :  { %1183 = vrot.lane.b32.xlu1 %v5255_v32, %s5164_s15 }
 0x64e   :  { %1181 = vrot.lane.b32.xlu1 %v5255_v32, %s5165_s16 }
 0x659   :  { %1105 = vrot.lane.b32.xlu0 %v5258_v34, %s5164_s15 }
 0x65d   :  { %1103 = vrot.lane.b32.xlu0 %v5258_v34, %s5165_s16 }
 0x661   :  { %1277 = vrot.lane.b32.xlu0 %v5258_v34, %s5166_s17 }
 0x6be   :  { %v934_v11 = vpop.xlane.xlu1 %933 }
 0x6bf   :  { %v936_v12 = vsub.f32 %v926_v0, %v934_v11 }
 0x6c1   :  { %v939_v13 = vmul.f32 1.442695, %v936_v12 }
 0x6c2   :  { %v1024_v14 = vpop.permute.xlu1 %1023 }
 0x6c3   :  { %5012 = vpow2.f32 %v939_v13  ;;  %4722 = vmatpush3.msra.mxu0 %v1024_v14 }
 0x6c4   :  { %4731 = vmatprep.subr.mxu0 %v5157_v29 }
 0x6c6   :  { %v1184_v17 = vpop.permute.xlu1 %1183 }
 0x6ca   :  { %v1182_v20 = vpop.permute.xlu1 %1181 }
 0x6cc   :  { %v931_v15 = vpop.xlane.xlu0 %930 }
 0x6cd   :  { %v935_v16 = vsub.f32 %v848_v8, %v931_v15 }
 0x6cf   :  { %v937_v18 = vmul.f32 1.442695, %v935_v16 }
 0x6d0   :  { %v5350_v19 = vpop.eup %5012  ;;  %v1106_v24 = vpop.permute.xlu0 %1105 }
 0x6d1   :  { %5014 = vpow2.f32 %v937_v18  ;;  %4724 = vmatmul.mubr.msk.f32.vlgmr.msra.gmra.mxu0 %vm447_vm5, %v5350_v19  ;;  %v944_v14 = vsel %vm447_vm5, %v5350_v19, 0.0 }
 0x6d2   :  { %4732 = vmatpush3.xpose.msk.msra.mxu0 %vm447_vm5, %v1184_v17  ;;  %4733 = vmatprep.mubr.msk.f32.mxu0 %vm5158_vm4, %v5157_v29 }
 0x6d3   :  { %4741 = vmatprep.subr.mxu0 %v5157_v29 }
 0x6d4   :  { %v1104_v25 = vpop.permute.xlu0 %1103 }
 0x6d5   :  { %4734 = vmatmul.mubr.msk.f32.vlgmr.msra.gmra.mxu0 %vm447_vm5, %v1182_v20 }
 0x6d6   :  { %4743 = vmatprep.mubr.msk.f32.mxu0 %vm5158_vm4, %v5157_v29 }
 0x6d8   :  { %v1278_v31 = vpop.permute.xlu0 %1277 }
 0x6de   :  { %v5361_v26 = vpop.eup %5014 }
 0x6df   :  { %4719 = vmatmul.mubr.msk.f32.vlgmr.msra.gmra.mxu1 %vm447_vm5, %v5361_v26  ;;  %v941_v15 = vsel %vm447_vm5, %v5361_v26, 0.0 }
 0x6e0   :  { %4727 = vmatpush3.xpose.msk.msra.mxu1 %vm447_vm5, %v1106_v24  ;;  %4728 = vmatprep.mubr.msk.f32.mxu1 %vm5158_vm4, %v5157_v29 }
 0x6e1   :  { %4736 = vmatprep.subr.mxu1 %v5157_v29 }
 0x6e3   :  { %4729 = vmatmul.mubr.msk.f32.vlgmr.msra.gmra.mxu1 %vm447_vm5, %v1104_v25 }
 0x6e4   :  { %4737 = vmatpush3.msra.mxu1 %v1278_v31  ;;  %4738 = vmatprep.mubr.msk.f32.mxu1 %vm5158_vm4, %v5157_v29 }
 0x6e5   :  { %4746 = vmatprep.subr.mxu1 %v5157_v29 }
 0x791   :  { %v5373_v33 = vpop.f32.mrf.mxu0 }
 0x793   :  { %v4725_v35 = vpop.f32.mrf.mxu0 }
 0x795   :  { %v1255_v36 = vpop.f32.mrf.mxu0 }
 0x796   :  { %v1256_v37 = vadd.f32 %v5288_v42, %v1255_v36  ;;  %v614_v36 = vsel %vm447_vm5, %v5317_v61, 0.0 }
 0x797   :  { %v4735_v39 = vpop.f32.mrf.mxu0 }
 0x798   :  { %v1262_v40 = vsel %vm447_vm5, %v1256_v37, -inf }
 0x799   :  { %1263 = vmax.xlane.f32.xlu1 %v1262_v40  ;;  %v611_v40 = vsel %vm447_vm5, %v5310_v59, 0.0 }
 0x79f   :  { %v5377_v41 = vpop.f32.mrf.mxu1 }
 0x7a1   :  { %v4720_v43 = vpop.f32.mrf.mxu1 }
 0x7a3   :  { %v1177_v44 = vpop.f32.mrf.mxu1 }
 0x7a4   :  { %v1178_v45 = vadd.f32 %v5282_v38, %v1177_v44 }
 0x7a5   :  { %v4730_v46 = vpop.f32.mrf.mxu1 }
 0x7a6   :  { %v1259_v47 = vsel %vm447_vm5, %v1178_v45, -inf }
 0x7a7   :  { %1260 = vmax.xlane.f32.xlu0 %v1259_v47 }
 0x7aa   :  { %1353 = vrot.lane.b32.xlu1 %v5255_v32, %s5166_s17 }
 0x7ae   :  { %1513 = vrot.lane.b32.xlu1 %v5255_v32, %s5167_s18 }
 0x7b2   :  { %1511 = vrot.lane.b32.xlu1 %v5255_v32, %s5168_s19 }
 0x7bd   :  { %1435 = vrot.lane.b32.xlu0 %v5258_v34, %s5167_s18 }
 0x7c1   :  { %1433 = vrot.lane.b32.xlu0 %v5258_v34, %s5168_s19 }
 0x822   :  { %v1264_v48 = vpop.xlane.xlu1 %1263 }
 0x823   :  { %v1266_v49 = vsub.f32 %v1256_v37, %v1264_v48 }
 0x825   :  { %v1269_v50 = vmul.f32 1.442695, %v1266_v49 }
 0x826   :  { %v1354_v51 = vpop.permute.xlu1 %1353 }
 0x827   :  { %5016 = vpow2.f32 %v1269_v50  ;;  %4742 = vmatpush3.msra.mxu0 %v1354_v51 }
 0x828   :  { %4751 = vmatprep.subr.mxu0 %v5157_v29 }
 0x82a   :  { %v1514_v54 = vpop.permute.xlu1 %1513 }
 0x82e   :  { %v1512_v58 = vpop.permute.xlu1 %1511 }
 0x830   :  { %v1261_v52 = vpop.xlane.xlu0 %1260 }
 0x831   :  { %v1265_v53 = vsub.f32 %v1178_v45, %v1261_v52 }
 0x833   :  { %v1267_v55 = vmul.f32 1.442695, %v1265_v53  ;;  %v5439_v53 = vld [vmem:[#allocation4 + $0xc8] sm:$0xff] }
 0x834   :  { %v5017_v57 = vpop.eup %5016  ;;  %v1436_v60 = vpop.permute.xlu0 %1435 }
 0x835   :  { %5018 = vpow2.f32 %v1267_v55  ;;  %4744 = vmatmul.mubr.msk.f32.vlgmr.msra.gmra.mxu0 %vm447_vm5, %v5017_v57  ;;  %v1274_v17 = vsel %vm447_vm5, %v5017_v57, 0.0 }
 0x836   :  { %4752 = vmatpush3.xpose.msk.msra.mxu0 %vm447_vm5, %v1514_v54  ;;  %4753 = vmatprep.mubr.msk.f32.mxu0 %vm5158_vm4, %v5157_v29  ;;  %v5441_v54 = vld [vmem:[#allocation4 + $0xc0] sm:$0xff] }
 0x837   :  { %4761 = vmatprep.subr.mxu0 %v5157_v29 }
 0x838   :  { %v1434_v63 = vpop.permute.xlu0 %1433 }
 0x839   :  { %4754 = vmatmul.mubr.msk.f32.vlgmr.msra.gmra.mxu0 %vm447_vm5, %v1512_v58 }
 0x83a   :  { %4763 = vmatprep.mubr.msk.f32.mxu0 %vm5158_vm4, %v5157_v29 }
 0x842   :  { %v5019_v62 = vpop.eup %5018 }
 0x843   :  { %4739 = vmatmul.mubr.msk.f32.vlgmr.msra.gmra.mxu1 %vm447_vm5, %v5019_v62  ;;  %v1271_v16 = vsel %vm447_vm5, %v5019_v62, 0.0 }
 0x844   :  { %4747 = vmatpush3.xpose.msk.msra.mxu1 %vm447_vm5, %v1436_v60  ;;  %4748 = vmatprep.mubr.msk.f32.mxu1 %vm5158_vm4, %v5157_v29 }
 0x845   :  { %4756 = vmatprep.subr.mxu1 %v5157_v29 }
 0x847   :  { %4749 = vmatmul.mubr.msk.f32.vlgmr.msra.gmra.mxu1 %vm447_vm5, %v1434_v63  ;;  %v5452_v63 = vld [vmem:[#allocation4 + $0xb0] sm:$0xff] }
 0x848   :  { %4758 = vmatprep.mubr.msk.f32.mxu1 %vm5158_vm4, %v5157_v29 }
 0x8f5   :  { %v5408_v0 = vpop.f32.mrf.mxu0 }
 0x8f7   :  { %v4745_v1 = vpop.f32.mrf.mxu0 }
 0x8f9   :  { %v1585_v2 = vpop.f32.mrf.mxu0 }
 0x8fa   :  { %v1586_v4 = vadd.f32 %v5288_v42, %v1585_v2 }
 0x8fb   :  { %v4755_v6 = vpop.f32.mrf.mxu0 }
 0x8fc   :  { %v1592_v7 = vsel %vm447_vm5, %v1586_v4, -inf }
 0x8fd   :  { %1593 = vmax.xlane.f32.xlu1 %v1592_v7 }
 0x903   :  { %v1349_v8 = vpop.f32.mrf.mxu1 }
 0x905   :  { %v4740_v9 = vpop.f32.mrf.mxu1 }
 0x907   :  { %v1507_v10 = vpop.f32.mrf.mxu1 }
 0x908   :  { %v1508_v11 = vadd.f32 %v5282_v38, %v1507_v10 }
 0x909   :  { %v4750_v12 = vpop.f32.mrf.mxu1 }
 0x90a   :  { %v1589_v13 = vsel %vm447_vm5, %v1508_v11, -inf }
 0x90b   :  { %1590 = vmax.xlane.f32.xlu0 %v1589_v13 }
 0x90e   :  { %1683 = vrot.lane.b32.xlu1 %v5255_v32, %s5169_s20 }
 0x921   :  { %1607 = vrot.lane.b32.xlu0 %v5258_v34, %s5169_s20 }
 0x932   :  { %945 = vadd.xlane.f32.xlu1 %v944_v14 }
 0x940   :  { %942 = vadd.xlane.f32.xlu0 %v941_v15 }
 0x944   :  { %1272 = vadd.xlane.f32.xlu0 %v1271_v16 }
 0x948   :  { %1275 = vadd.xlane.f32.xlu0 %v1274_v17 }
 0x986   :  { %v1594_v18 = vpop.xlane.xlu1 %1593 }
 0x987   :  { %v1596_v20 = vsub.f32 %v1586_v4, %v1594_v18 }
 0x989   :  { %v1599_v32 = vmul.f32 1.442695, %v1596_v20 }
 0x98a   :  { %v1684_v24 = vpop.permute.xlu1 %1683 }
 0x98b   :  { %5020 = vpow2.f32 %v1599_v32  ;;  %4762 = vmatpush3.msra.mxu0 %v1684_v24 }
 0x994   :  { %v1591_v34 = vpop.xlane.xlu0 %1590 }
 0x995   :  { %v1595_v25 = vsub.f32 %v1508_v11, %v1591_v34 }
 0x997   :  { %v1597_v19 = vmul.f32 1.442695, %v1595_v25 }
 0x998   :  { %v5021_v31 = vpop.eup %5020  ;;  %v1608_v35 = vpop.permute.xlu0 %1607 }
 0x999   :  { %5022 = vpow2.f32 %v1597_v19  ;;  %4757 = vmatpush3.msra.mxu1 %v1608_v35  ;;  %4764 = vmatmul.mubr.msk.f32.vlgmr.msra.gmra.mxu0 %vm447_vm5, %v5021_v31  ;;  %v1604_v26 = vsel %vm447_vm5, %v5021_v31, 0.0 }
 0x99a   :  { %1605 = vadd.xlane.f32.xlu0 %v1604_v26  ;;  %4766 = vmatprep.subr.mxu1 %v5439_v53 }
 0x99e   :  { %615 = vadd.xlane.f32.xlu0 %v614_v36 }
 0x9a6   :  { %v5023_v37 = vpop.eup %5022 }
 0x9a7   :  { %4759 = vmatmul.mubr.msk.f32.vlgmr.msra.gmra.mxu1 %vm447_vm5, %v5023_v37  ;;  %v1601_v39 = vsel %vm447_vm5, %v5023_v37, 0.0 }
 0x9a8   :  { %1602 = vadd.xlane.f32.xlu1 %v1601_v39  ;;  %4767 = vmatpush3.msra.mxu1 %v5439_v53 }
 0x9a9   :  { %4768 = vmatprep.subr.mxu1 %v5441_v54 }
 0x9aa   :  { %4769 = vmatpush3.msra.mxu1 %v5441_v54 }
 0x9ac   :  { %612 = vadd.xlane.f32.xlu1 %v611_v40 }
 0x9bb   :  { %v946_v43 = vpop.xlane.xlu1 %945 }
 0x9bc   :  { %5024 = vrcp.f32 %v946_v43 }
 0x9c9   :  { %v5025_v44 = vpop.eup %5024  ;;  %v943_v45 = vpop.xlane.xlu0 %942 }
 0x9ca   :  { %5026 = vrcp.f32 %v943_v45  ;;  %v1102_v46 = vmul.f32 %v5025_v44, %v5373_v33 }
 0x9cc   :  { %1767 = vrot.lane.b32.xlu0 %v1102_v46, %s5152_s22  ;;  %v5477_v46 = vld [vmem:[#allocation4 + $0xe8] sm:$0xff] }
 0x9cd   :  { %v1273_v61 = vpop.xlane.xlu0 %1272  ;;  %4777 = vmatprep.subr.mxu0 %v5477_v46 }
 0x9ce   :  { %5028 = vrcp.f32 %v1273_v61  ;;  %4778 = vmatpush3.msra.mxu0 %v5477_v46  ;;  %v5489_v61 = vld [vmem:[#allocation4 + $0xd0] sm:$0xff] }
 0x9d1   :  { %v1276_v47 = vpop.xlane.xlu0 %1275 }
 0x9d2   :  { %5030 = vrcp.f32 %v1276_v47 }
 0x9d7   :  { %v5027_v48 = vpop.eup %5026 }
 0x9d8   :  { %v1101_v49 = vmul.f32 %v5027_v48, %v5377_v41  ;;  %v5445_v41 = vld [vmem:[#allocation4 + $0xb8] sm:$0xff] }
 0x9d9   :  { %4770 = vmatprep.subr.mxu1 %v5445_v41 }
 0x9da   :  { %1765 = vrot.lane.b32.xlu1 %v1101_v49, %s5152_s22  ;;  %4771 = vmatpush3.msra.mxu1 %v5445_v41 }
 0x9db   :  { %v5029_v59 = vpop.eup %5028  ;;  %4772 = vmatprep.subr.mxu1 %v5452_v63 }
 0x9dc   :  { %v1431_v50 = vmul.f32 %v5029_v59, %v1349_v8  ;;  %4773 = vmatpush3.msra.mxu1 %v5452_v63 }
 0x9de   :  { %1773 = vrot.lane.b32.xlu1 %v1431_v50, %s5170_s21 }
 0x9df   :  { %v5031_v51 = vpop.eup %5030 }
 0x9e0   :  { %v1432_v52 = vmul.f32 %v5031_v51, %v5408_v0 }
 0x9e2   :  { %1775 = vrot.lane.b32.xlu1 %v1432_v52, %s5170_s21 }
 0xa23   :  { %v1606_v33 = vpop.xlane.xlu0 %1605 }
 0xa24   :  { %5032 = vrcp.f32 %v1606_v33 }
 0xa27   :  { %v616_v7 = vpop.xlane.xlu0 %615 }
 0xa31   :  { %v1603_v55 = vpop.xlane.xlu1 %1602  ;;  %v5033_v57 = vpop.eup %5032 }
 0xa32   :  { %5034 = vrcp.f32 %v1603_v55 }
 0xa35   :  { %v613_v6 = vpop.xlane.xlu1 %612 }
 0xa36   :  { %5036 = vrcp.f32 %v613_v6 }
 0xa37   :  { %5038 = vrcp.f32 %v616_v7  ;;  %v5494_v7 = vld [vmem:[#allocation2 + $0x17] ss:$0 sm:$0xff] }
 0xa3e   :  { %v1768_v13 = vpop.permute.xlu0 %1767 }
 0xa3f   :  { %v5035_v0 = vpop.eup %5034 }
 0xa43   :  { %v5037_v10 = vpop.eup %5036 }
 0xa44   :  { %v5039_v11 = vpop.eup %5038  ;;  %v771_v14 = vmul.f32 %v5037_v10, %v5331_v3  ;;  %v5467_v3 = vld [vmem:[#allocation2 + $0x16] ss:$0 sm:$0xff] }
 0xa45   :  { %v772_v15 = vmul.f32 %v5039_v11, %v5333_v5 }
 0xa47   :  { %v1788_v18 = vsel %vm447_vm5, %v772_v15, %v1768_v13 }
 0xa4c   :  { %v1766_v8 = vpop.permute.xlu1 %1765 }
 0xa4d   :  { %v1787_v16 = vsel %vm447_vm5, %v771_v14, %v1766_v8 }
 0xa50   :  { %v1774_v9 = vpop.permute.xlu1 %1773 }
 0xa51   :  { %v1789_v20 = vsel %vm187_vm2, %v1787_v16, %v1774_v9  ;;  %v5496_v9 = vld [vmem:[#allocation2 + $0x18] ss:$0 sm:$0xff] }
 0xa54   :  { %v1776_v12 = vpop.permute.xlu1 %1775 }
 0xa55   :  { %v1790_v24 = vsel %vm187_vm2, %v1788_v18, %v1776_v12  ;;  %v5538_v18 = vld [vmem:[#allocation4 + $0x100] sm:$0xff] }
 0xa59   :  { %v1755_v58 = vpop.f32.mrf.mxu0 }
 0xa5a   :  { %v1762_v60 = vmul.f32 %v5033_v57, %v1755_v58 }
 0xa5b   :  { %v4765_v62 = vpop.f32.mrf.mxu0 }
 0xa5c   :  { %1783 = vrot.lane.b32.xlu1 %v1762_v60, %s5171_s23 }
 0xa67   :  { %v1679_v1 = vpop.f32.mrf.mxu1 }
 0xa68   :  { %v1761_v2 = vmul.f32 %v5035_v0, %v1679_v1 }
 0xa69   :  { %v4760_v4 = vpop.f32.mrf.mxu1 }
 0xa6a   :  { %1781 = vrot.lane.b32.xlu0 %v1761_v2, %s5171_s23 }
 0xace   :  { %v1784_v17 = vpop.permute.xlu1 %1783 }
 0xacf   :  { %v1793_v25 = vsel %vm1791_vm6, %v1790_v24, %v1784_v17  ;;  %v5518_v17 = vld [vmem:[#allocation4 + $0x128] sm:$0xff]  ;;  %v5551_v24 = vld [vmem:[#allocation2 + $0x19] ss:$0 sm:$0xff] }
 0xad0   :  { %4788 = vmatprep.subr.mxu1 %v5518_v17 }
 0xadc   :  { %v1782_v32 = vpop.permute.xlu0 %1781 }
 0xadd   :  { %v1792_v34 = vsel %vm1791_vm6, %v1789_v20, %v1782_v32  ;;  %v5541_v20 = vld [vmem:[#allocation4 + $0xf8] sm:$0xff]  ;;  %v5544_v32 = vld [vmem:[#allocation4 + $0xf0] sm:$0xff] }
 0xade   :  { %4774 = vmatprep.mubr.msk.f32.mxu1 %vm350_vm3, %v1792_v34 }
 0xadf   :  { %4775 = vmatmul.mubr.msk.f32.vlgmr.msra.gmra.mxu1 %vm350_vm3, %v1793_v25 }
 0xae0   :  { %4789 = vmatpush3.msra.mxu1 %v5518_v17 }
 0xb9f   :  { %v4776_v5 = vpop.f32.mrf.mxu1 }
 0xba0   :  { %v1876_v19 = vadd.f32 %v4776_v5, %v5467_v3 }
 0xba1   :  { %v1870_v31 = vpop.f32.mrf.mxu1 }
 0xba2   :  { %v1880_v35 = vadd.f32 %v1876_v19, %v5240_v28  ;;  %v1871_v26 = vadd.f32 %v5467_v3, %v1870_v31  ;;  %v5479_v28 = vld [vmem:[#allocation4 + $0xe0] sm:$0xff] }
 0xba3   :  { %4779 = vmatprep.subr.mxu0 %v5479_v28 }
 0xba4   :  { %v1879_v36 = vadd.f32 %v1871_v26, %v5238_v27  ;;  %v1886_v37 = vsel %vm350_vm3, %v1880_v35, 0.0  ;;  %v1890_v44 = vmul.f32 %v1880_v35, %v1880_v35  ;;  %v5483_v27 = vld [vmem:[#allocation4 + $0xd8] sm:$0xff]  ;;  %4780 = vmatpush3.msra.mxu0 %v5479_v28 }
 0xba5   :  { %1887 = vadd.xlane.f32.xlu1 %v1886_v37  ;;  %4781 = vmatprep.subr.mxu0 %v5483_v27 }
 0xba6   :  { %v1883_v39 = vsel %vm350_vm3, %v1879_v36, 0.0  ;;  %v1889_v40 = vmul.f32 %v1879_v36, %v1879_v36  ;;  %v1894_v45 = vsel %vm350_vm3, %v1890_v44, 0.0  ;;  %4782 = vmatpush3.msra.mxu0 %v5483_v27 }
 0xba7   :  { %1884 = vadd.xlane.f32.xlu0 %v1883_v39  ;;  %4783 = vmatprep.subr.mxu0 %v5489_v61 }
 0xba8   :  { %v1891_v43 = vsel %vm350_vm3, %v1889_v40, 0.0  ;;  %4784 = vmatpush3.msra.mxu0 %v5489_v61 }
 0xba9   :  { %4807 = vmatprep.subr.mxu0 %v5220_v56 }
 0xbab   :  { %1892 = vadd.xlane.f32.xlu0 %v1891_v43 }
 0xbaf   :  { %1895 = vadd.xlane.f32.xlu0 %v1894_v45 }
 0xc2e   :  { %v1888_v49 = vpop.xlane.xlu1 %1887 }
 0xc2f   :  { %v1898_v50 = vmul.f32 0.03125, %v1888_v49 }
 0xc30   :  { %v1885_v47 = vpop.xlane.xlu0 %1884 }
 0xc31   :  { %v1897_v48 = vmul.f32 0.03125, %v1885_v47  ;;  %v1902_v57 = vmul.f32 %v1898_v50, %v1898_v50  ;;  %v1908_v10 = vsub.f32 %v1880_v35, %v1898_v50 }
 0xc33   :  { %v1901_v51 = vmul.f32 %v1897_v48, %v1897_v48  ;;  %v1907_v4 = vsub.f32 %v1879_v36, %v1897_v48 }
 0xc34   :  { %v1893_v59 = vpop.xlane.xlu0 %1892 }
 0xc35   :  { %v1899_v52 = vmul.f32 0.03125, %v1893_v59 }
 0xc37   :  { %v1903_v33 = vsub.f32 %v1899_v52, %v1901_v51 }
 0xc38   :  { %v1896_v55 = vpop.xlane.xlu0 %1895 }
 0xc39   :  { %v1905_v58 = vmax.f32 %v1903_v33, 0.0  ;;  %v1900_v60 = vmul.f32 0.03125, %v1896_v55  ;;  %v5559_v55 = vld [vmem:[#allocation2 + $0x1a] ss:$0 sm:$0xff] }
 0xc3b   :  { %v1909_v62 = vadd.f32 1e-12, %v1905_v58  ;;  %v1904_v0 = vsub.f32 %v1900_v60, %v1902_v57 }
 0xc3d   :  { %5040 = vrsqrt.f32 %v1909_v62  ;;  %v1906_v1 = vmax.f32 %v1904_v0, 0.0 }
 0xc3f   :  { %v1910_v2 = vadd.f32 1e-12, %v1906_v1 }
 0xc41   :  { %5042 = vrsqrt.f32 %v1910_v2 }
 0xc4a   :  { %v5041_v6 = vpop.eup %5040 }
 0xc4b   :  { %v1913_v8 = vmul.f32 %v5041_v6, %v1907_v4 }
 0xc4d   :  { %v1919_v11 = vmul.f32 %v5494_v7, %v1913_v8 }
 0xc4e   :  { %v5043_v12 = vpop.eup %5042 }
 0xc4f   :  { %v1914_v13 = vmul.f32 %v5043_v12, %v1908_v10  ;;  %v5500_v14 = vadd.f32 %v5496_v9, %v1919_v11 }
 0xc51   :  { %v1920_v15 = vmul.f32 %v5494_v7, %v1914_v13  ;;  %4785 = vmatprep.mubr.msk.f32.mxu0 %vm350_vm3, %v5500_v14 }
 0xc53   :  { %v5506_v16 = vadd.f32 %v5496_v9, %v1920_v15 }
 0xc55   :  { %4786 = vmatmul.mubr.msk.f32.vlgmr.msra.gmra.mxu0 %vm350_vm3, %v5506_v16 }
 0xc56   :  { %4808 = vmatpush3.msra.mxu0 %v5220_v56  ;;  %v5522_v56 = vld [vmem:[#allocation4 + $0x120] sm:$0xff] }
 0xc57   :  { %4809 = vmatprep.subr.mxu0 %v5226_v21  ;;  %4790 = vmatprep.subr.mxu1 %v5522_v56 }
 0xc58   :  { %4810 = vmatpush3.msra.mxu0 %v5226_v21  ;;  %4791 = vmatpush3.msra.mxu1 %v5522_v56  ;;  %v5526_v21 = vld [vmem:[#allocation4 + $0x118] sm:$0xff] }
 0xc59   :  { %4811 = vmatprep.subr.mxu0 %v5230_v22  ;;  %4792 = vmatprep.subr.mxu1 %v5526_v21 }
 0xc5a   :  { %4812 = vmatpush3.msra.mxu0 %v5230_v22  ;;  %4793 = vmatpush3.msra.mxu1 %v5526_v21  ;;  %v5530_v22 = vld [vmem:[#allocation4 + $0x110] sm:$0xff] }
 0xc5b   :  { %4813 = vmatprep.subr.mxu0 %v5234_v23  ;;  %4794 = vmatprep.subr.mxu1 %v5530_v22 }
 0xc5c   :  { %4814 = vmatpush3.msra.mxu0 %v5234_v23  ;;  %4795 = vmatpush3.msra.mxu1 %v5530_v22  ;;  %v5534_v23 = vld [vmem:[#allocation4 + $0x108] sm:$0xff] }
 0xc5d   :  { %4818 = vmatprep.subr.mxu0 %v5157_v29  ;;  %4796 = vmatprep.subr.mxu1 %v5534_v23 }
 0xc5e   :  { %4797 = vmatpush3.msra.mxu1 %v5534_v23 }
 0xc5f   :  { %4798 = vmatprep.subr.mxu1 %v5538_v18 }
 0xc60   :  { %4799 = vmatpush3.msra.mxu1 %v5538_v18 }
 0xc61   :  { %4800 = vmatprep.subr.mxu1 %v5541_v20 }
 0xc62   :  { %4801 = vmatpush3.msra.mxu1 %v5541_v20 }
 0xc63   :  { %4802 = vmatprep.subr.mxu1 %v5544_v32 }
 0xc64   :  { %4803 = vmatpush3.msra.mxu1 %v5544_v32 }
 0xc65   :  { %4828 = vmatprep.subr.mxu1 %v5157_v29 }
 0xd15   :  { %v4787_v34 = vpop.f32.mrf.mxu0 }
 0xd16   :  { %v2009_v25 = vadd.f32 %v4787_v34, %v5551_v24 }
 0xd17   :  { %v2003_v5 = vpop.f32.mrf.mxu0 }
 0xd18   :  { %v2013_v19 = vmul.f32 %v2009_v25, %v2009_v25  ;;  %v2004_v31 = vadd.f32 %v5551_v24, %v2003_v5 }
 0xd1a   :  { %v2015_v35 = vmul.f32 %v2013_v19, %v2009_v25  ;;  %v2012_v26 = vmul.f32 %v2004_v31, %v2004_v31 }
 0xd1c   :  { %v2017_v36 = vmul.f32 0.044715, %v2015_v35  ;;  %v2014_v37 = vmul.f32 %v2012_v26, %v2004_v31 }
 0xd1e   :  { %v2019_v39 = vadd.f32 %v2017_v36, %v2009_v25  ;;  %v2016_v40 = vmul.f32 0.044715, %v2014_v37 }
 0xd20   :  { %v2021_v43 = vmul.f32 0.7978846, %v2019_v39  ;;  %v2018_v44 = vadd.f32 %v2016_v40, %v2004_v31 }
 0xd22   :  { %5044 = vtanh.f32 %v2021_v43  ;;  %v2020_v45 = vmul.f32 0.7978846, %v2018_v44 }
 0xd24   :  { %5046 = vtanh.f32 %v2020_v45 }
 0xd2f   :  { %v5045_v47 = vpop.eup %5044 }
 0xd30   :  { %v2025_v48 = vadd.f32 1.0, %v5045_v47  ;;  %v5569_v47 = vld [vmem:[#allocation2 + $0x1b] ss:$0 sm:$0xff] }
 0xd31   :  { %v5047_v49 = vpop.eup %5046 }
 0xd32   :  { %v2024_v59 = vadd.f32 1.0, %v5047_v49  ;;  %v2027_v50 = vmul.f32 0.5, %v2025_v48 }
 0xd34   :  { %v2026_v51 = vmul.f32 0.5, %v2024_v59  ;;  %v2029_v33 = vmul.f32 %v2027_v50, %v2009_v25 }
 0xd36   :  { %v2028_v52 = vmul.f32 %v2026_v51, %v2004_v31  ;;  %v5572_v51 = vld [vmem:[#allocation2 + $0x1c] ss:$0 sm:$0xff] }
 0xd38   :  { %4804 = vmatprep.mubr.msk.f32.mxu1 %vm2034_vm7, %v2028_v52 }
 0xd39   :  { %4805 = vmatmul.mubr.msk.f32.vlgmr.msra.gmra.mxu1 %vm2034_vm7, %v2029_v33 }
 0xd3a   :  { %4830 = vmatprep.mubr.msk.f32.mxu1 %vm5158_vm4, %v5157_v29 }
 0xdf9   :  { %v4806_v57 = vpop.f32.mrf.mxu1 }
 0xdfa   :  { %v2113_v58 = vadd.f32 %v4806_v57, %v5559_v55 }
 0xdfb   :  { %v2107_v60 = vpop.f32.mrf.mxu1 }
 0xdfc   :  { %v2117_v62 = vadd.f32 %v2113_v58, %v5506_v16  ;;  %v2108_v0 = vadd.f32 %v5559_v55, %v2107_v60 }
 0xdfe   :  { %v2116_v1 = vadd.f32 %v2108_v0, %v5500_v14  ;;  %v2123_v2 = vsel %vm350_vm3, %v2117_v62, 0.0  ;;  %v2127_v4 = vmul.f32 %v2117_v62, %v2117_v62 }
 0xdff   :  { %2124 = vadd.xlane.f32.xlu0 %v2123_v2 }
 0xe00   :  { %v2120_v6 = vsel %vm350_vm3, %v2116_v1, 0.0  ;;  %v2126_v8 = vmul.f32 %v2116_v1, %v2116_v1  ;;  %v2131_v10 = vsel %vm350_vm3, %v2127_v4, 0.0 }
 0xe01   :  { %2121 = vadd.xlane.f32.xlu1 %v2120_v6 }
 0xe02   :  { %v2128_v11 = vsel %vm350_vm3, %v2126_v8, 0.0 }
 0xe03   :  { %2132 = vadd.xlane.f32.xlu0 %v2131_v10 }
 0xe05   :  { %2129 = vadd.xlane.f32.xlu1 %v2128_v11 }
 0xe88   :  { %v2125_v12 = vpop.xlane.xlu0 %2124 }
 0xe89   :  { %v2135_v13 = vmul.f32 0.03125, %v2125_v12 }
 0xe8a   :  { %v2122_v15 = vpop.xlane.xlu1 %2121 }
 0xe8b   :  { %v2134_v16 = vmul.f32 0.03125, %v2122_v15  ;;  %v2139_v14 = vmul.f32 %v2135_v13, %v2135_v13  ;;  %v2145_v43 = vsub.f32 %v2117_v62, %v2135_v13 }
 0xe8c   :  { %v2133_v34 = vpop.xlane.xlu0 %2132 }
 0xe8d   :  { %v2137_v25 = vmul.f32 0.03125, %v2133_v34  ;;  %v2138_v19 = vmul.f32 %v2134_v16, %v2134_v16  ;;  %v2144_v45 = vsub.f32 %v2116_v1, %v2134_v16 }
 0xe8e   :  { %v2130_v5 = vpop.xlane.xlu1 %2129 }
 0xe8f   :  { %v2141_v31 = vsub.f32 %v2137_v25, %v2139_v14  ;;  %v2136_v35 = vmul.f32 0.03125, %v2130_v5 }
 0xe91   :  { %v2143_v26 = vmax.f32 %v2141_v31, 0.0  ;;  %v2140_v36 = vsub.f32 %v2136_v35, %v2138_v19 }
 0xe93   :  { %v2147_v37 = vadd.f32 1e-12, %v2143_v26  ;;  %v2142_v39 = vmax.f32 %v2140_v36, 0.0 }
 0xe95   :  { %5048 = vrsqrt.f32 %v2147_v37  ;;  %v2146_v40 = vadd.f32 1e-12, %v2142_v39 }
 0xe97   :  { %5050 = vrsqrt.f32 %v2146_v40 }
 0xea2   :  { %v5049_v44 = vpop.eup %5048 }
 0xea3   :  { %v2151_v48 = vmul.f32 %v5049_v44, %v2145_v43 }
 0xea4   :  { %v5051_v49 = vpop.eup %5050 }
 0xea5   :  { %v2150_v59 = vmul.f32 %v5051_v49, %v2144_v45  ;;  %v2157_v50 = vmul.f32 %v5569_v47, %v2151_v48  ;;  %v5664_v49 = vld [vmem:[%s5881_s1] ss:$0 sm:$0xff] }
 0xea7   :  { %v2156_v52 = vmul.f32 %v5569_v47, %v2150_v59  ;;  %v5579_v57 = vadd.f32 %v5572_v51, %v2157_v50 }
 0xea9   :  { %v5576_v33 = vadd.f32 %v5572_v51, %v2156_v52 }
 0xeab   :  { %4815 = vmatprep.mubr.msk.f32.mxu0 %vm350_vm3, %v5576_v33 }
 0xeac   :  { %4816 = vmatmul.mubr.msk.f32.vlgmr.msra.gmra.mxu0 %vm350_vm3, %v5579_v57 }
 0xead   :  { %4820 = vmatprep.mubr.msk.f32.mxu0 %vm5158_vm4, %v5157_v29 }
 0xf6c   :  { %v4817_v58 = vpop.f32.mrf.mxu0 }
 0xf6d   :  { %v5588_v60 = vadd.f32 %v4817_v58, %v5252_v30 }
 0xf6e   :  { %v2236_v62 = vpop.f32.mrf.mxu0 }
 0xf6f   :  { %v5591_v0 = vadd.f32 %v5252_v30, %v2236_v62  ;;  %2323 = vrot.lane.b32.xlu0 %v5588_v60, %s5159_s0 }
 0xf71   :  { %2246 = vrot.lane.b32.xlu1 %v5591_v0, %s5159_s0 }
 0xf75   :  { %2417 = vrot.lane.b32.xlu1 %v5591_v0, %s5160_s3 }
 0xfe1   :  { %v2324_v2 = vpop.permute.xlu0 %2323 }
 0xfe3   :  { %v2247_v1 = vpop.permute.xlu1 %2246 }
 0xfe4   :  { %4819 = vmatpush3.xpose.msk.msra.mxu0 %vm447_vm5, %v2247_v1  ;;  %v5671_v1 = vld [vmem:[%s5881_s1 + $0x1] ss:$0 sm:$0xff] }
 0xfe5   :  { %4823 = vmatprep.subr.mxu0 %v5157_v29 }
 0xfe7   :  { %4821 = vmatmul.mubr.msk.f32.vlgmr.msra.gmra.mxu0 %vm447_vm5, %v5591_v0  ;;  %v2418_v30 = vpop.permute.xlu1 %2417 }
 0xfe8   :  { %4824 = vmatpush3.xpose.msk.msra.mxu0 %vm447_vm5, %v2324_v2  ;;  %4829 = vmatpush3.msra.mxu1 %v2418_v30 }
 0xfe9   :  { %4825 = vmatprep.mubr.msk.f32.mxu0 %vm5158_vm4, %v5157_v29  ;;  %4833 = vmatprep.subr.mxu0 %v5157_v29 }
 0xfea   :  { %4838 = vmatprep.subr.mxu1 %v5157_v29 }
 0xfeb   :  { %4826 = vmatmul.mubr.msk.f32.vlgmr.msra.gmra.mxu0 %vm447_vm5, %v5588_v60 }
 0xfec   :  { %4835 = vmatprep.mubr.msk.f32.mxu0 %vm5158_vm4, %v5157_v29 }
0x10a7   :  { %v2318_v4 = vpop.f32.mrf.mxu0 }
0x10a8   :  { %v2319_v6 = vadd.f32 %v5282_v38, %v2318_v4 }
0x10a9   :  { %v4822_v8 = vpop.f32.mrf.mxu0 }
0x10aa   :  { %v2399_v10 = vsel %vm447_vm5, %v2319_v6, -inf }
0x10ab   :  { %2400 = vmax.xlane.f32.xlu1 %v2399_v10  ;;  %v2395_v11 = vpop.f32.mrf.mxu0 }
0x10ac   :  { %v2396_v12 = vadd.f32 %v5288_v42, %v2395_v11 }
0x10ad   :  { %v4827_v13 = vpop.f32.mrf.mxu0 }
0x10ae   :  { %v2402_v15 = vsel %vm447_vm5, %v2396_v12, -inf }
0x10af   :  { %2403 = vmax.xlane.f32.xlu0 %v2402_v15 }
0x10bc   :  { %2575 = vrot.lane.b32.xlu1 %v5591_v0, %s5161_s12 }
0x10c0   :  { %2653 = vrot.lane.b32.xlu1 %v5588_v60, %s5161_s12 }
0x10c4   :  { %2651 = vrot.lane.b32.xlu1 %v5588_v60, %s5162_s13 }
0x10c5   :  { %2493 = vrot.lane.b32.xlu0 %v5588_v60, %s5160_s3 }
0x10c8   :  { %2823 = vrot.lane.b32.xlu1 %v5588_v60, %s5163_s14 }
0x10c9   :  { %2573 = vrot.lane.b32.xlu0 %v5591_v0, %s5162_s13 }
0x10cc   :  { %2983 = vrot.lane.b32.xlu1 %v5588_v60, %s5164_s15 }
0x10cd   :  { %2747 = vrot.lane.b32.xlu0 %v5591_v0, %s5163_s14 }
0x1134   :  { %v2401_v38 = vpop.xlane.xlu1 %2400 }
0x1135   :  { %v2405_v42 = vsub.f32 %v2319_v6, %v2401_v38 }
0x1137   :  { %v2407_v16 = vmul.f32 1.442695, %v2405_v42 }
0x1138   :  { %v2404_v34 = vpop.xlane.xlu0 %2403  ;;  %v2576_v19 = vpop.permute.xlu1 %2575 }
0x1139   :  { %5052 = vpow2.f32 %v2407_v16  ;;  %v2406_v14 = vsub.f32 %v2396_v12, %v2404_v34 }
0x113b   :  { %v2409_v25 = vmul.f32 1.442695, %v2406_v14 }
0x113c   :  { %v2494_v5 = vpop.permute.xlu0 %2493  ;;  %v2654_v31 = vpop.permute.xlu1 %2653 }
0x113d   :  { %5054 = vpow2.f32 %v2409_v25  ;;  %4834 = vmatpush3.msra.mxu0 %v2494_v5 }
0x113e   :  { %4843 = vmatprep.subr.mxu0 %v5157_v29 }
0x1140   :  { %v2574_v35 = vpop.permute.xlu0 %2573  ;;  %v2652_v36 = vpop.permute.xlu1 %2651 }
0x1144   :  { %v2748_v39 = vpop.permute.xlu0 %2747  ;;  %v2824_v40 = vpop.permute.xlu1 %2823 }
0x1146   :  { %v5633_v26 = vpop.eup %5052 }
0x1147   :  { %4831 = vmatmul.mubr.msk.f32.vlgmr.msra.gmra.mxu1 %vm447_vm5, %v5633_v26 }
0x1148   :  { %4839 = vmatpush3.xpose.msk.msra.mxu1 %vm447_vm5, %v2576_v19  ;;  %4840 = vmatprep.mubr.msk.f32.mxu1 %vm5158_vm4, %v5157_v29  ;;  %v2984_v6 = vpop.permute.xlu1 %2983 }
0x1149   :  { %4848 = vmatprep.subr.mxu1 %v5157_v29 }
0x114a   :  { %v5641_v37 = vpop.eup %5054 }
0x114b   :  { %4836 = vmatmul.mubr.msk.f32.vlgmr.msra.gmra.mxu0 %vm447_vm5, %v5641_v37  ;;  %4841 = vmatmul.mubr.msk.f32.vlgmr.msra.gmra.mxu1 %vm447_vm5, %v2574_v35 }
0x114c   :  { %4844 = vmatpush3.xpose.msk.msra.mxu0 %vm447_vm5, %v2654_v31  ;;  %4849 = vmatpush3.msra.mxu1 %v2748_v39 }
0x114d   :  { %4845 = vmatprep.mubr.msk.f32.mxu0 %vm5158_vm4, %v5157_v29  ;;  %4853 = vmatprep.subr.mxu0 %v5157_v29 }
0x114e   :  { %4850 = vmatprep.mubr.msk.f32.mxu1 %vm5158_vm4, %v5157_v29  ;;  %4858 = vmatprep.subr.mxu1 %v5157_v29 }
0x114f   :  { %4846 = vmatmul.mubr.msk.f32.vlgmr.msra.gmra.mxu0 %vm447_vm5, %v2652_v36 }
0x1150   :  { %4854 = vmatpush3.msra.mxu0 %v2824_v40  ;;  %4855 = vmatprep.mubr.msk.f32.mxu0 %vm5158_vm4, %v5157_v29 }
0x1151   :  { %4863 = vmatprep.subr.mxu0 %v5157_v29 }
0x1207   :  { %v5657_v43 = vpop.f32.mrf.mxu1 }
0x1209   :  { %v4832_v44 = vpop.f32.mrf.mxu1 }
0x120b   :  { %v5659_v45 = vpop.f32.mrf.mxu0  ;;  %v2647_v48 = vpop.f32.mrf.mxu1 }
0x120c   :  { %v2648_v59 = vadd.f32 %v5664_v49, %v2647_v48 }
0x120d   :  { %v4837_v50 = vpop.f32.mrf.mxu0  ;;  %v4842_v52 = vpop.f32.mrf.mxu1 }
0x120e   :  { %v2729_v58 = vsel %vm447_vm5, %v2648_v59, -inf }
0x120f   :  { %2730 = vmax.xlane.f32.xlu0 %v2729_v58  ;;  %v2725_v62 = vpop.f32.mrf.mxu0 }
0x1210   :  { %v2726_v2 = vadd.f32 %v5671_v1, %v2725_v62 }
0x1211   :  { %v4847_v30 = vpop.f32.mrf.mxu0 }
0x1212   :  { %v2732_v4 = vsel %vm447_vm5, %v2726_v2, -inf }
0x1213   :  { %2733 = vmax.xlane.f32.xlu1 %v2732_v4 }
0x1224   :  { %2981 = vrot.lane.b32.xlu1 %v5588_v60, %s5165_s16 }
0x1225   :  { %2905 = vrot.lane.b32.xlu0 %v5591_v0, %s5164_s15 }
0x1228   :  { %3153 = vrot.lane.b32.xlu1 %v5588_v60, %s5166_s17 }
0x1229   :  { %2903 = vrot.lane.b32.xlu0 %v5591_v0, %s5165_s16 }
0x122c   :  { %3313 = vrot.lane.b32.xlu1 %v5588_v60, %s5167_s18 }
0x122d   :  { %3077 = vrot.lane.b32.xlu0 %v5591_v0, %s5166_s17 }
0x1298   :  { %v2731_v8 = vpop.xlane.xlu0 %2730 }
0x1299   :  { %v2735_v10 = vsub.f32 %v2648_v59, %v2731_v8 }
0x129b   :  { %v2737_v11 = vmul.f32 1.442695, %v2735_v10 }
0x129c   :  { %v2734_v12 = vpop.xlane.xlu1 %2733  ;;  %v2906_v38 = vpop.permute.xlu0 %2905 }
0x129d   :  { %5056 = vpow2.f32 %v2737_v11  ;;  %v2736_v13 = vsub.f32 %v2726_v2, %v2734_v12 }
0x129f   :  { %v2739_v15 = vmul.f32 1.442695, %v2736_v13 }
0x12a0   :  { %v2904_v42 = vpop.permute.xlu0 %2903  ;;  %v2982_v34 = vpop.permute.xlu1 %2981 }
0x12a1   :  { %5058 = vpow2.f32 %v2739_v15 }
0x12a4   :  { %v3078_v25 = vpop.permute.xlu0 %3077  ;;  %v3154_v5 = vpop.permute.xlu1 %3153 }
0x12a8   :  { %v3314_v62 = vpop.permute.xlu1 %3313 }
0x12aa   :  { %v5687_v16 = vpop.eup %5056 }
0x12ab   :  { %4851 = vmatmul.mubr.msk.f32.vlgmr.msra.gmra.mxu1 %vm447_vm5, %v5687_v16 }
0x12ac   :  { %4859 = vmatpush3.xpose.msk.msra.mxu1 %vm447_vm5, %v2906_v38  ;;  %4860 = vmatprep.mubr.msk.f32.mxu1 %vm5158_vm4, %v5157_v29 }
0x12ad   :  { %4868 = vmatprep.subr.mxu1 %v5157_v29 }
0x12ae   :  { %v5695_v14 = vpop.eup %5058 }
0x12af   :  { %4856 = vmatmul.mubr.msk.f32.vlgmr.msra.gmra.mxu0 %vm447_vm5, %v5695_v14  ;;  %4861 = vmatmul.mubr.msk.f32.vlgmr.msra.gmra.mxu1 %vm447_vm5, %v2904_v42 }
0x12b0   :  { %4864 = vmatpush3.xpose.msk.msra.mxu0 %vm447_vm5, %v2984_v6  ;;  %4869 = vmatpush3.msra.mxu1 %v3078_v25 }
0x12b1   :  { %4865 = vmatprep.mubr.msk.f32.mxu0 %vm5158_vm4, %v5157_v29  ;;  %4873 = vmatprep.subr.mxu0 %v5157_v29 }
0x12b2   :  { %4870 = vmatprep.mubr.msk.f32.mxu1 %vm5158_vm4, %v5157_v29  ;;  %4878 = vmatprep.subr.mxu1 %v5157_v29 }
0x12b3   :  { %4866 = vmatmul.mubr.msk.f32.vlgmr.msra.gmra.mxu0 %vm447_vm5, %v2982_v34 }
0x12b4   :  { %4874 = vmatpush3.msra.mxu0 %v3154_v5  ;;  %4875 = vmatprep.mubr.msk.f32.mxu0 %vm5158_vm4, %v5157_v29 }
0x12b5   :  { %4883 = vmatprep.subr.mxu0 %v5157_v29 }
0x136b   :  { %v5711_v19 = vpop.f32.mrf.mxu1 }
0x136d   :  { %v4852_v31 = vpop.f32.mrf.mxu1 }
0x136f   :  { %v5713_v35 = vpop.f32.mrf.mxu0  ;;  %v2977_v36 = vpop.f32.mrf.mxu1 }
0x1370   :  { %v2978_v39 = vadd.f32 %v5664_v49, %v2977_v36 }
0x1371   :  { %v4857_v40 = vpop.f32.mrf.mxu0  ;;  %v4862_v44 = vpop.f32.mrf.mxu1 }
0x1372   :  { %v3059_v48 = vsel %vm447_vm5, %v2978_v39, -inf }
0x1373   :  { %3060 = vmax.xlane.f32.xlu0 %v3059_v48  ;;  %v3055_v59 = vpop.f32.mrf.mxu0 }
0x1374   :  { %v3056_v50 = vadd.f32 %v5671_v1, %v3055_v59 }
0x1375   :  { %v4867_v52 = vpop.f32.mrf.mxu0 }
0x1376   :  { %v3062_v58 = vsel %vm447_vm5, %v3056_v50, -inf }
0x1377   :  { %3063 = vmax.xlane.f32.xlu1 %v3062_v58  ;;  %v2744_v58 = vsel %vm447_vm5, %v5695_v14, 0.0 }
0x1388   :  { %3311 = vrot.lane.b32.xlu1 %v5588_v60, %s5168_s19 }
0x1389   :  { %3235 = vrot.lane.b32.xlu0 %v5591_v0, %s5167_s18 }
0x138d   :  { %3233 = vrot.lane.b32.xlu0 %v5591_v0, %s5168_s19 }
0x13fc   :  { %v3061_v2 = vpop.xlane.xlu0 %3060 }
0x13fd   :  { %v3065_v30 = vsub.f32 %v2978_v39, %v3061_v2 }
0x13ff   :  { %v3067_v4 = vmul.f32 1.442695, %v3065_v30 }
0x1400   :  { %v3064_v6 = vpop.xlane.xlu1 %3063  ;;  %v3236_v11 = vpop.permute.xlu0 %3235 }
0x1401   :  { %5060 = vpow2.f32 %v3067_v4  ;;  %v3066_v8 = vsub.f32 %v3056_v50, %v3064_v6 }
0x1403   :  { %v3069_v10 = vmul.f32 1.442695, %v3066_v8 }
0x1404   :  { %v3234_v15 = vpop.permute.xlu0 %3233  ;;  %v3312_v38 = vpop.permute.xlu1 %3311 }
0x1405   :  { %5062 = vpow2.f32 %v3069_v10 }
0x140e   :  { %v5061_v12 = vpop.eup %5060 }
0x140f   :  { %4871 = vmatmul.mubr.msk.f32.vlgmr.msra.gmra.mxu1 %vm447_vm5, %v5061_v12  ;;  %v3071_v52 = vsel %vm447_vm5, %v5061_v12, 0.0 }
0x1410   :  { %4879 = vmatpush3.xpose.msk.msra.mxu1 %vm447_vm5, %v3236_v11  ;;  %4880 = vmatprep.mubr.msk.f32.mxu1 %vm5158_vm4, %v5157_v29  ;;  %v2411_v11 = vsel %vm447_vm5, %v5633_v26, 0.0 }
0x1411   :  { %4888 = vmatprep.subr.mxu1 %v5157_v29 }
0x1412   :  { %v5063_v13 = vpop.eup %5062 }
0x1413   :  { %4876 = vmatmul.mubr.msk.f32.vlgmr.msra.gmra.mxu0 %vm447_vm5, %v5063_v13  ;;  %4881 = vmatmul.mubr.msk.f32.vlgmr.msra.gmra.mxu1 %vm447_vm5, %v3234_v15 }
0x1414   :  { %4884 = vmatpush3.xpose.msk.msra.mxu0 %vm447_vm5, %v3314_v62  ;;  %4885 = vmatprep.mubr.msk.f32.mxu0 %vm5158_vm4, %v5157_v29 }
0x1415   :  { %4893 = vmatprep.subr.mxu0 %v5157_v29  ;;  %4890 = vmatprep.mubr.msk.f32.mxu1 %vm5158_vm4, %v5157_v29 }
0x1417   :  { %4886 = vmatmul.mubr.msk.f32.vlgmr.msra.gmra.mxu0 %vm447_vm5, %v3312_v38 }
0x1418   :  { %4895 = vmatprep.mubr.msk.f32.mxu0 %vm5158_vm4, %v5157_v29 }
0x14cf   :  { %v5741_v42 = vpop.f32.mrf.mxu1 }
0x14d1   :  { %v4872_v34 = vpop.f32.mrf.mxu1 }
0x14d3   :  { %v5743_v25 = vpop.f32.mrf.mxu0  ;;  %v3307_v5 = vpop.f32.mrf.mxu1 }
0x14d4   :  { %v3308_v31 = vadd.f32 %v5664_v49, %v3307_v5  ;;  %v2741_v49 = vsel %vm447_vm5, %v5687_v16, 0.0 }
0x14d5   :  { %v4877_v36 = vpop.f32.mrf.mxu0  ;;  %v4882_v39 = vpop.f32.mrf.mxu1 }
0x14d6   :  { %v3389_v40 = vsel %vm447_vm5, %v3308_v31, -inf }
0x14d7   :  { %3390 = vmax.xlane.f32.xlu0 %v3389_v40  ;;  %v3385_v44 = vpop.f32.mrf.mxu0 }
0x14d8   :  { %v3386_v48 = vadd.f32 %v5671_v1, %v3385_v44  ;;  %v3074_v1 = vsel %vm447_vm5, %v5063_v13, 0.0 }
0x14d9   :  { %v4887_v59 = vpop.f32.mrf.mxu0 }
0x14da   :  { %v3392_v50 = vsel %vm447_vm5, %v3386_v48, -inf }
0x14db   :  { %3393 = vmax.xlane.f32.xlu1 %v3392_v50 }
0x14ec   :  { %3483 = vrot.lane.b32.xlu1 %v5588_v60, %s5169_s20 }
0x14ed   :  { %3407 = vrot.lane.b32.xlu0 %v5591_v0, %s5169_s20 }
0x150c   :  { %2742 = vadd.xlane.f32.xlu0 %v2741_v49 }
0x1510   :  { %3072 = vadd.xlane.f32.xlu0 %v3071_v52  ;;  %2745 = vadd.xlane.f32.xlu1 %v2744_v58 }
0x1514   :  { %3075 = vadd.xlane.f32.xlu0 %v3074_v1 }
0x1560   :  { %v3391_v62 = vpop.xlane.xlu0 %3390 }
0x1561   :  { %v3395_v2 = vsub.f32 %v3308_v31, %v3391_v62 }
0x1563   :  { %v3397_v60 = vmul.f32 1.442695, %v3395_v2 }
0x1564   :  { %v3408_v30 = vpop.permute.xlu0 %3407  ;;  %v3394_v4 = vpop.xlane.xlu1 %3393 }
0x1565   :  { %5064 = vpow2.f32 %v3397_v60  ;;  %v3396_v0 = vsub.f32 %v3386_v48, %v3394_v4  ;;  %4889 = vmatpush3.msra.mxu1 %v3408_v30 }
0x1566   :  { %4898 = vmatprep.subr.mxu1 %v5439_v53 }
0x1567   :  { %v3399_v16 = vmul.f32 1.442695, %v3396_v0 }
0x1568   :  { %v3484_v6 = vpop.permute.xlu1 %3483 }
0x1569   :  { %5066 = vpow2.f32 %v3399_v16  ;;  %4894 = vmatpush3.msra.mxu0 %v3484_v6 }
0x156a   :  { %4909 = vmatprep.subr.mxu0 %v5477_v46 }
0x1572   :  { %v5065_v14 = vpop.eup %5064 }
0x1573   :  { %4891 = vmatmul.mubr.msk.f32.vlgmr.msra.gmra.mxu1 %vm447_vm5, %v5065_v14  ;;  %v3401_v8 = vsel %vm447_vm5, %v5065_v14, 0.0 }
0x1574   :  { %3402 = vadd.xlane.f32.xlu1 %v3401_v8  ;;  %4899 = vmatpush3.msra.mxu1 %v5439_v53  ;;  %v2414_v53 = vsel %vm447_vm5, %v5641_v37, 0.0 }
0x1575   :  { %4900 = vmatprep.subr.mxu1 %v5441_v54 }
0x1576   :  { %v5067_v10 = vpop.eup %5066  ;;  %4901 = vmatpush3.msra.mxu1 %v5441_v54 }
0x1577   :  { %4896 = vmatmul.mubr.msk.f32.vlgmr.msra.gmra.mxu0 %vm447_vm5, %v5067_v10  ;;  %v3404_v12 = vsel %vm447_vm5, %v5067_v10, 0.0  ;;  %4902 = vmatprep.subr.mxu1 %v5445_v41 }
0x1578   :  { %2412 = vadd.xlane.f32.xlu1 %v2411_v11  ;;  %3405 = vadd.xlane.f32.xlu0 %v3404_v12 }
0x1579   :  { %4903 = vmatpush3.msra.mxu1 %v5445_v41  ;;  %4910 = vmatpush3.msra.mxu0 %v5477_v46 }
0x157a   :  { %4904 = vmatprep.subr.mxu1 %v5452_v63  ;;  %4911 = vmatprep.subr.mxu0 %v5479_v28 }
0x157b   :  { %4905 = vmatpush3.msra.mxu1 %v5452_v63  ;;  %4912 = vmatpush3.msra.mxu0 %v5479_v28 }
0x157c   :  { %2415 = vadd.xlane.f32.xlu0 %v2414_v53  ;;  %4913 = vmatprep.subr.mxu0 %v5483_v27 }
0x157d   :  { %4914 = vmatpush3.msra.mxu0 %v5483_v27  ;;  %4920 = vmatprep.subr.mxu1 %v5518_v17 }
0x157e   :  { %4915 = vmatprep.subr.mxu0 %v5489_v61 }
0x157f   :  { %4916 = vmatpush3.msra.mxu0 %v5489_v61 }
0x1595   :  { %v2743_v54 = vpop.xlane.xlu0 %2742 }
0x1596   :  { %5068 = vrcp.f32 %v2743_v54 }
0x1599   :  { %v3073_v41 = vpop.xlane.xlu0 %3072  ;;  %v2746_v46 = vpop.xlane.xlu1 %2745 }
0x159a   :  { %5070 = vrcp.f32 %v3073_v41 }
0x159b   :  { %5072 = vrcp.f32 %v2746_v46 }
0x159d   :  { %v3076_v63 = vpop.xlane.xlu0 %3075 }
0x159e   :  { %5074 = vrcp.f32 %v3076_v63 }
0x15a3   :  { %v5069_v28 = vpop.eup %5068 }
0x15a4   :  { %v2901_v26 = vmul.f32 %v5069_v28, %v5711_v19 }
0x15a6   :  { %3565 = vrot.lane.b32.xlu1 %v2901_v26, %s5152_s22 }
0x15a7   :  { %v5071_v27 = vpop.eup %5070 }
0x15a8   :  { %v5073_v37 = vpop.eup %5072  ;;  %v3231_v13 = vmul.f32 %v5071_v27, %v5741_v42 }
0x15a9   :  { %v2902_v15 = vmul.f32 %v5073_v37, %v5713_v35 }
0x15aa   :  { %3573 = vrot.lane.b32.xlu1 %v3231_v13, %s5170_s21 }
0x15ab   :  { %v5075_v61 = vpop.eup %5074  ;;  %3567 = vrot.lane.b32.xlu0 %v2902_v15, %s5152_s22 }
0x15ac   :  { %v3232_v38 = vmul.f32 %v5075_v61, %v5743_v25 }
0x15ae   :  { %3575 = vrot.lane.b32.xlu1 %v3232_v38, %s5170_s21 }
0x15fd   :  { %v3403_v34 = vpop.xlane.xlu1 %3402 }
0x15fe   :  { %5076 = vrcp.f32 %v3403_v34 }
0x1601   :  { %v3406_v19 = vpop.xlane.xlu0 %3405  ;;  %v2413_v48 = vpop.xlane.xlu1 %2412 }
0x1602   :  { %5078 = vrcp.f32 %v3406_v19 }
0x1603   :  { %5080 = vrcp.f32 %v2413_v48 }
0x1605   :  { %v2416_v25 = vpop.xlane.xlu0 %2415 }
0x1606   :  { %5082 = vrcp.f32 %v2416_v25 }
0x160b   :  { %v5077_v5 = vpop.eup %5076 }
0x160f   :  { %v5079_v35 = vpop.eup %5078 }
0x1610   :  { %v5081_v50 = vpop.eup %5080 }
0x1611   :  { %v2571_v58 = vmul.f32 %v5081_v50, %v5657_v43 }
0x1613   :  { %v5083_v1 = vpop.eup %5082 }
0x1614   :  { %v2572_v4 = vmul.f32 %v5083_v1, %v5659_v45 }
0x1618   :  { %v3566_v59 = vpop.permute.xlu1 %3565 }
0x1619   :  { %v3587_v62 = vsel %vm447_vm5, %v2571_v58, %v3566_v59 }
0x161c   :  { %v3574_v49 = vpop.permute.xlu1 %3573 }
0x161d   :  { %v3568_v52 = vpop.permute.xlu0 %3567  ;;  %v3589_v2 = vsel %vm187_vm2, %v3587_v62, %v3574_v49 }
0x161e   :  { %v3588_v16 = vsel %vm447_vm5, %v2572_v4, %v3568_v52 }
0x1620   :  { %v3576_v60 = vpop.permute.xlu1 %3575 }
0x1621   :  { %v3590_v6 = vsel %vm187_vm2, %v3588_v16, %v3576_v60 }
0x1633   :  { %v3479_v31 = vpop.f32.mrf.mxu1 }
0x1634   :  { %v3561_v36 = vmul.f32 %v5077_v5, %v3479_v31 }
0x1635   :  { %v4892_v39 = vpop.f32.mrf.mxu1 }
0x1636   :  { %3581 = vrot.lane.b32.xlu0 %v3561_v36, %s5171_s23 }
0x1637   :  { %v3555_v42 = vpop.f32.mrf.mxu0 }
0x1638   :  { %v3562_v40 = vmul.f32 %v5079_v35, %v3555_v42 }
0x1639   :  { %v4897_v44 = vpop.f32.mrf.mxu0 }
0x163a   :  { %3583 = vrot.lane.b32.xlu1 %v3562_v40, %s5171_s23 }
0x16a8   :  { %v3582_v30 = vpop.permute.xlu0 %3581 }
0x16a9   :  { %v3591_v0 = vsel %vm1791_vm6, %v3589_v2, %v3582_v30 }
0x16aa   :  { %4906 = vmatprep.mubr.msk.f32.mxu1 %vm350_vm3, %v3591_v0 }
0x16ac   :  { %v3584_v14 = vpop.permute.xlu1 %3583 }
0x16ad   :  { %v3592_v43 = vsel %vm1791_vm6, %v3590_v6, %v3584_v14 }
0x16ae   :  { %4907 = vmatmul.mubr.msk.f32.vlgmr.msra.gmra.mxu1 %vm350_vm3, %v3592_v43 }
0x16af   :  { %4921 = vmatpush3.msra.mxu1 %v5518_v17 }
0x16b0   :  { %4922 = vmatprep.subr.mxu1 %v5522_v56 }
0x16b1   :  { %4923 = vmatpush3.msra.mxu1 %v5522_v56 }
0x16b2   :  { %4924 = vmatprep.subr.mxu1 %v5526_v21 }
0x16b3   :  { %4925 = vmatpush3.msra.mxu1 %v5526_v21 }
0x16b4   :  { %4926 = vmatprep.subr.mxu1 %v5530_v22 }
0x16b5   :  { %4927 = vmatpush3.msra.mxu1 %v5530_v22 }
0x16b6   :  { %4928 = vmatprep.subr.mxu1 %v5534_v23 }
0x16b7   :  { %4929 = vmatpush3.msra.mxu1 %v5534_v23 }
0x16b8   :  { %4930 = vmatprep.subr.mxu1 %v5538_v18 }
0x16b9   :  { %4931 = vmatpush3.msra.mxu1 %v5538_v18 }
0x16ba   :  { %4932 = vmatprep.subr.mxu1 %v5541_v20 }
0x16bb   :  { %4933 = vmatpush3.msra.mxu1 %v5541_v20 }
0x16bc   :  { %4934 = vmatprep.subr.mxu1 %v5544_v32 }
0x16bd   :  { %4935 = vmatpush3.msra.mxu1 %v5544_v32 }
0x16be   :  { %4968 = vmatprep.subr.mxu1 %v5157_v29 }
0x176e   :  { %v4908_v17 = vpop.f32.mrf.mxu1 }
0x176f   :  { %v3671_v56 = vadd.f32 %v4908_v17, %v5467_v3 }
0x1770   :  { %v3665_v21 = vpop.f32.mrf.mxu1 }
0x1771   :  { %v3675_v22 = vadd.f32 %v3671_v56, %v5579_v57  ;;  %v3666_v23 = vadd.f32 %v5467_v3, %v3665_v21 }
0x1773   :  { %v3674_v18 = vadd.f32 %v3666_v23, %v5576_v33  ;;  %v3681_v45 = vsel %vm350_vm3, %v3675_v22, 0.0  ;;  %v3685_v10 = vmul.f32 %v3675_v22, %v3675_v22 }
0x1774   :  { %3682 = vadd.xlane.f32.xlu1 %v3681_v45 }
0x1775   :  { %v3678_v20 = vsel %vm350_vm3, %v3674_v18, 0.0  ;;  %v3684_v8 = vmul.f32 %v3674_v18, %v3674_v18  ;;  %v3689_v11 = vsel %vm350_vm3, %v3685_v10, 0.0 }
0x1776   :  { %3679 = vadd.xlane.f32.xlu0 %v3678_v20 }
0x1777   :  { %v3686_v32 = vsel %vm350_vm3, %v3684_v8, 0.0 }
0x177a   :  { %3687 = vadd.xlane.f32.xlu0 %v3686_v32 }
0x177e   :  { %3690 = vadd.xlane.f32.xlu0 %v3689_v11 }
0x17fd   :  { %v3683_v54 = vpop.xlane.xlu1 %3682 }
0x17fe   :  { %v3693_v41 = vmul.f32 0.03125, %v3683_v54  ;;  %v3953_v54 = vld [vmem:[#allocation4 + $0x148] sm:$0xff] }
0x17ff   :  { %v3680_v12 = vpop.xlane.xlu0 %3679  ;;  %4939 = vmatprep.subr.mxu0 %v3953_v54 }
0x1800   :  { %v3692_v53 = vmul.f32 0.03125, %v3680_v12  ;;  %v3697_v27 = vmul.f32 %v3693_v41, %v3693_v41  ;;  %v3703_v36 = vsub.f32 %v3675_v22, %v3693_v41  ;;  %v3950_v41 = vld [vmem:[#allocation4 + $0x130] sm:$0xff] }
0x1802   :  { %v3696_v46 = vmul.f32 %v3692_v53, %v3692_v53  ;;  %v3702_v19 = vsub.f32 %v3674_v18, %v3692_v53 }
0x1803   :  { %v3688_v3 = vpop.xlane.xlu0 %3687 }
0x1804   :  { %v3694_v63 = vmul.f32 0.03125, %v3688_v3  ;;  %v3952_v3 = vld [vmem:[#allocation4 + $0x140] sm:$0xff] }
0x1806   :  { %v3698_v28 = vsub.f32 %v3694_v63, %v3696_v46 }
0x1807   :  { %v3691_v26 = vpop.xlane.xlu0 %3690 }
0x1808   :  { %v3700_v37 = vmax.f32 %v3698_v28, 0.0  ;;  %v3695_v13 = vmul.f32 0.03125, %v3691_v26 }
0x180a   :  { %v3704_v15 = vadd.f32 1e-12, %v3700_v37  ;;  %v3699_v61 = vsub.f32 %v3695_v13, %v3697_v27 }
0x180c   :  { %5084 = vrsqrt.f32 %v3704_v15  ;;  %v3701_v38 = vmax.f32 %v3699_v61, 0.0 }
0x180e   :  { %v3705_v34 = vadd.f32 1e-12, %v3701_v38 }
0x1810   :  { %5086 = vrsqrt.f32 %v3705_v34 }
0x1819   :  { %v5085_v5 = vpop.eup %5084 }
0x181a   :  { %v3708_v31 = vmul.f32 %v5085_v5, %v3702_v19 }
0x181c   :  { %v3714_v39 = vmul.f32 %v5494_v7, %v3708_v31 }
0x181d   :  { %v5087_v35 = vpop.eup %5086 }
0x181e   :  { %v3709_v42 = vmul.f32 %v5087_v35, %v3703_v36  ;;  %v3720_v40 = vadd.f32 %v5496_v9, %v3714_v39 }
0x1820   :  { %v3715_v44 = vmul.f32 %v5494_v7, %v3709_v42  ;;  %4917 = vmatprep.mubr.msk.f32.mxu0 %vm350_vm3, %v3720_v40 }
0x1822   :  { %v3721_v48 = vadd.f32 %v5496_v9, %v3715_v44 }
0x1824   :  { %4918 = vmatmul.mubr.msk.f32.vlgmr.msra.gmra.mxu0 %vm350_vm3, %v3721_v48 }
0x1825   :  { %4940 = vmatpush3.msra.mxu0 %v3953_v54 }
0x1826   :  { %4941 = vmatprep.subr.mxu0 %v3952_v3 }
0x1827   :  { %4942 = vmatpush3.msra.mxu0 %v3952_v3 }
0x18e4   :  { %v4919_v25 = vpop.f32.mrf.mxu0 }
0x18e5   :  { %v3800_v59 = vadd.f32 %v4919_v25, %v5551_v24 }
0x18e6   :  { %v3794_v50 = vpop.f32.mrf.mxu0 }
0x18e7   :  { %v3804_v49 = vmul.f32 %v3800_v59, %v3800_v59  ;;  %v3795_v52 = vadd.f32 %v5551_v24, %v3794_v50 }
0x18e9   :  { %v3806_v58 = vmul.f32 %v3804_v49, %v3800_v59  ;;  %v3803_v1 = vmul.f32 %v3795_v52, %v3795_v52 }
0x18eb   :  { %v3808_v62 = vmul.f32 0.044715, %v3806_v58  ;;  %v3805_v2 = vmul.f32 %v3803_v1, %v3795_v52  ;;  %v4459_v58 = vld [vmem:[#allocation2 + $0x1d] ss:$0 sm:$0xff] }
0x18ed   :  { %v3810_v60 = vadd.f32 %v3808_v62, %v3800_v59  ;;  %v3807_v30 = vmul.f32 0.044715, %v3805_v2 }
0x18ef   :  { %v3812_v7 = vmul.f32 0.7978846, %v3810_v60  ;;  %v3809_v4 = vadd.f32 %v3807_v30, %v3795_v52 }
0x18f1   :  { %5088 = vtanh.f32 %v3812_v7  ;;  %v3811_v0 = vmul.f32 0.7978846, %v3809_v4 }
0x18f3   :  { %5090 = vtanh.f32 %v3811_v0 }
0x18fe   :  { %v5089_v9 = vpop.eup %5088 }
0x18ff   :  { %v3816_v16 = vadd.f32 1.0, %v5089_v9 }
0x1900   :  { %v5091_v6 = vpop.eup %5090 }
0x1901   :  { %v3815_v14 = vadd.f32 1.0, %v5091_v6  ;;  %v3818_v43 = vmul.f32 0.5, %v3816_v16 }
0x1903   :  { %v3817_v17 = vmul.f32 0.5, %v3815_v14  ;;  %v3820_v21 = vmul.f32 %v3818_v43, %v3800_v59 }
0x1905   :  { %v3819_v56 = vmul.f32 %v3817_v17, %v3795_v52 }
0x1907   :  { %4936 = vmatprep.mubr.msk.f32.mxu1 %vm2034_vm7, %v3819_v56 }
0x1908   :  { %4937 = vmatmul.mubr.msk.f32.vlgmr.msra.gmra.mxu1 %vm2034_vm7, %v3820_v21 }
0x1909   :  { %4976 = vmatprep.mubr.msk.f32.mxu1 %vm5158_vm4, %v5157_v29 }
0x19c8   :  { %v4938_v24 = vpop.f32.mrf.mxu1 }
0x19c9   :  { %v3899_v22 = vadd.f32 %v4938_v24, %v5559_v55 }
0x19ca   :  { %v3893_v23 = vpop.f32.mrf.mxu1 }
0x19cb   :  { %v3903_v18 = vadd.f32 %v3899_v22, %v3721_v48  ;;  %v3894_v45 = vadd.f32 %v5559_v55, %v3893_v23  ;;  %v3951_v55 = vld [vmem:[#allocation4 + $0x138] sm:$0xff] }
0x19cc   :  { %4943 = vmatprep.subr.mxu0 %v3951_v55 }
0x19cd   :  { %v3902_v20 = vadd.f32 %v3894_v45, %v3720_v40  ;;  %v3909_v8 = vsel %vm350_vm3, %v3903_v18, 0.0  ;;  %v3913_v32 = vmul.f32 %v3903_v18, %v3903_v18  ;;  %4944 = vmatpush3.msra.mxu0 %v3951_v55 }
0x19ce   :  { %3910 = vadd.xlane.f32.xlu0 %v3909_v8  ;;  %4945 = vmatprep.subr.mxu0 %v3950_v41 }
0x19cf   :  { %v3906_v10 = vsel %vm350_vm3, %v3902_v20, 0.0  ;;  %v3912_v11 = vmul.f32 %v3902_v20, %v3902_v20  ;;  %v3917_v12 = vsel %vm350_vm3, %v3913_v32, 0.0  ;;  %4946 = vmatpush3.msra.mxu0 %v3950_v41 }
0x19d0   :  { %3907 = vadd.xlane.f32.xlu1 %v3906_v10 }
0x19d1   :  { %v3914_v53 = vsel %vm350_vm3, %v3912_v11, 0.0 }
0x19d2   :  { %3918 = vadd.xlane.f32.xlu0 %v3917_v12  ;;  %v4105_v12 = vld [vmem:[#allocation4 + $0x158] sm:$0xff] }
0x19d3   :  { %4950 = vmatprep.subr.mxu0 %v4105_v12 }
0x19d4   :  { %3915 = vadd.xlane.f32.xlu1 %v3914_v53  ;;  %v4104_v53 = vld [vmem:[#allocation4 + $0x150] sm:$0xff] }
0x1a57   :  { %v3911_v46 = vpop.xlane.xlu0 %3910 }
0x1a58   :  { %v3921_v63 = vmul.f32 0.03125, %v3911_v46 }
0x1a59   :  { %v3908_v28 = vpop.xlane.xlu1 %3907 }
0x1a5a   :  { %v3920_v26 = vmul.f32 0.03125, %v3908_v28  ;;  %v3925_v37 = vmul.f32 %v3921_v63, %v3921_v63  ;;  %v3931_v35 = vsub.f32 %v3903_v18, %v3921_v63 }
0x1a5b   :  { %v3919_v27 = vpop.xlane.xlu0 %3918 }
0x1a5c   :  { %v3923_v13 = vmul.f32 0.03125, %v3919_v27  ;;  %v3924_v61 = vmul.f32 %v3920_v26, %v3920_v26  ;;  %v3930_v40 = vsub.f32 %v3902_v20, %v3920_v26 }
0x1a5d   :  { %v3916_v15 = vpop.xlane.xlu1 %3915 }
0x1a5e   :  { %v3927_v38 = vsub.f32 %v3923_v13, %v3925_v37  ;;  %v3922_v34 = vmul.f32 0.03125, %v3916_v15 }
0x1a60   :  { %v3929_v19 = vmax.f32 %v3927_v38, 0.0  ;;  %v3926_v5 = vsub.f32 %v3922_v34, %v3924_v61 }
0x1a62   :  { %v3933_v31 = vadd.f32 1e-12, %v3929_v19  ;;  %v3928_v36 = vmax.f32 %v3926_v5, 0.0 }
0x1a64   :  { %5092 = vrsqrt.f32 %v3933_v31  ;;  %v3932_v39 = vadd.f32 1e-12, %v3928_v36 }
0x1a66   :  { %5094 = vrsqrt.f32 %v3932_v39  ;;  %v4462_v39 = vld [vmem:[#allocation2 + $0x1e] ss:$0 sm:$0xff] }
0x1a71   :  { %v5093_v42 = vpop.eup %5092 }
0x1a72   :  { %v3937_v44 = vmul.f32 %v5093_v42, %v3931_v35 }
0x1a73   :  { %v5095_v48 = vpop.eup %5094 }
0x1a74   :  { %v3936_v25 = vmul.f32 %v5095_v48, %v3930_v40  ;;  %v3943_v59 = vmul.f32 %v5569_v47, %v3937_v44  ;;  %v4463_v48 = vld [vmem:[#allocation2 + $0x1f] ss:$0 sm:$0xff] }
0x1a76   :  { %v3942_v50 = vmul.f32 %v5569_v47, %v3936_v25  ;;  %v3949_v52 = vadd.f32 %v5572_v51, %v3943_v59 }
0x1a78   :  { %v3948_v49 = vadd.f32 %v5572_v51, %v3942_v50 }
0x1a7a   :  { %4947 = vmatprep.mubr.msk.f32.mxu0 %vm350_vm3, %v3948_v49  ;;  %v4197_v49 = vld [vmem:[#allocation4 + $0x178] sm:$0xff] }
0x1a7b   :  { %4948 = vmatmul.mubr.msk.f32.vlgmr.msra.gmra.mxu0 %vm350_vm3, %v3949_v52  ;;  %v4196_v52 = vld [vmem:[#allocation4 + $0x170] sm:$0xff] }
0x1a7c   :  { %4951 = vmatpush3.msra.mxu0 %v4105_v12 }
0x1a7d   :  { %4952 = vmatprep.subr.mxu0 %v4104_v53 }
0x1a7e   :  { %4953 = vmatpush3.msra.mxu0 %v4104_v53 }
0x1a7f   :  { %4957 = vmatprep.subr.mxu0 %v5157_v29 }
0x1b3b   :  { %v4949_v1 = vpop.f32.mrf.mxu0 }
0x1b3c   :  { %v4037_v62 = vadd.f32 %v4949_v1, %v4459_v58  ;;  %v4208_v1 = vrot.slane %v5579_v57, 7  ;;  %v4200_v57 = vld [vmem:[#allocation4 + $0x188] sm:$0xff] }
0x1b3d   :  { %v4031_v2 = vpop.f32.mrf.mxu0 }
0x1b3e   :  { %v4041_v60 = vmul.f32 %v4037_v62, %v4037_v62  ;;  %v4032_v30 = vadd.f32 %v4459_v58, %v4031_v2  ;;  %v4195_v58 = vld [vmem:[#allocation4 + $0x168] sm:$0xff]  ;;  %v4210_v2 = vsel %vm4209_vm8, %v4208_v1, %v5576_v33 }
0x1b40   :  { %v4043_v7 = vmul.f32 %v4041_v60, %v4037_v62  ;;  %v4040_v4 = vmul.f32 %v4032_v30, %v4032_v30  ;;  %v4202_v60 = vld [vmem:[#allocation4 + $0x198] sm:$0xff] }
0x1b41   :  { %4969 = vmatpush3.msra.mxu1 %v4202_v60 }
0x1b42   :  { %v4045_v0 = vmul.f32 0.044715, %v4043_v7  ;;  %v4042_v9 = vmul.f32 %v4040_v4, %v4032_v30  ;;  %4970 = vmatprep.subr.mxu1 %v5157_v29  ;;  %v4199_v7 = vld [vmem:[#allocation4 + $0x180] sm:$0xff]  ;;  %v4464_v4 = vld [vmem:[#allocation2 + $0x20] ss:$0 sm:$0xff] }
0x1b44   :  { %v4047_v16 = vadd.f32 %v4045_v0, %v4037_v62  ;;  %v4044_v47 = vmul.f32 0.044715, %v4042_v9 }
0x1b46   :  { %v4049_v6 = vmul.f32 0.7978846, %v4047_v16  ;;  %v4046_v14 = vadd.f32 %v4044_v47, %v4032_v30  ;;  %v4467_v47 = vld [vmem:[#allocation2 + $0x21] ss:$0 sm:$0xff] }
0x1b48   :  { %5096 = vtanh.f32 %v4049_v6  ;;  %v4048_v51 = vmul.f32 0.7978846, %v4046_v14 }
0x1b4a   :  { %5098 = vtanh.f32 %v4048_v51 }
0x1b55   :  { %v5097_v43 = vpop.eup %5096 }
0x1b56   :  { %v4053_v17 = vadd.f32 1.0, %v5097_v43  ;;  %v4469_v43 = vld [vmem:[#allocation2 + $0x22] ss:$0 sm:$0xff] }
0x1b57   :  { %v5099_v56 = vpop.eup %5098 }
0x1b58   :  { %v4055_v21 = vmul.f32 0.5, %v4053_v17  ;;  %v4052_v24 = vadd.f32 1.0, %v5099_v56 }
0x1b5a   :  { %v4057_v22 = vmul.f32 %v4055_v21, %v4037_v62  ;;  %v4054_v23 = vmul.f32 0.5, %v4052_v24  ;;  %v4194_v62 = vld [vmem:[#allocation4 + $0x160] sm:$0xff] }
0x1b5c   :  { %v4063_v18 = vsel %vm187_vm2, %v4057_v22, 0.0  ;;  %v4056_v45 = vmul.f32 %v4054_v23, %v4032_v30  ;;  %v4067_v20 = vmul.f32 %v4057_v22, %v4057_v22  ;;  %v4201_v30 = vld [vmem:[#allocation4 + $0x190] sm:$0xff] }
0x1b5d   :  { %4064 = vadd.xlane.f32.xlu0 %v4063_v18  ;;  %4971 = vmatpush3.msra.mxu1 %v4201_v30 }
0x1b5e   :  { %v4060_v8 = vsel %vm187_vm2, %v4056_v45, 0.0  ;;  %v4066_v32 = vmul.f32 %v4056_v45, %v4056_v45  ;;  %v4071_v10 = vsel %vm187_vm2, %v4067_v20, 0.0  ;;  %4972 = vmatprep.subr.mxu1 %v5157_v29 }
0x1b5f   :  { %4061 = vadd.xlane.f32.xlu1 %v4060_v8  ;;  %4973 = vmatpush3.msra.mxu1 %v4200_v57 }
0x1b60   :  { %v4068_v11 = vsel %vm187_vm2, %v4066_v32, 0.0  ;;  %4974 = vmatprep.subr.mxu1 %v5157_v29 }
0x1b61   :  { %4072 = vadd.xlane.f32.xlu0 %v4071_v10  ;;  %4975 = vmatpush3.msra.mxu1 %v4199_v7 }
0x1b63   :  { %4069 = vadd.xlane.f32.xlu1 %v4068_v11 }
0x1be6   :  { %v4065_v54 = vpop.xlane.xlu0 %4064 }
0x1be7   :  { %v4075_v3 = vmul.f32 0.0625, %v4065_v54 }
0x1be8   :  { %v4062_v55 = vpop.xlane.xlu1 %4061 }
0x1be9   :  { %v4074_v41 = vmul.f32 0.0625, %v4062_v55  ;;  %v4079_v63 = vmul.f32 %v4075_v3, %v4075_v3  ;;  %v4085_v5 = vsub.f32 %v4057_v22, %v4075_v3 }
0x1bea   :  { %v4073_v46 = vpop.xlane.xlu0 %4072 }
0x1beb   :  { %v4077_v28 = vmul.f32 0.0625, %v4073_v46  ;;  %v4078_v27 = vmul.f32 %v4074_v41, %v4074_v41  ;;  %v4084_v36 = vsub.f32 %v4056_v45, %v4074_v41 }
0x1bec   :  { %v4070_v26 = vpop.xlane.xlu1 %4069 }
0x1bed   :  { %v4081_v37 = vsub.f32 %v4077_v28, %v4079_v63  ;;  %v4076_v13 = vmul.f32 0.0625, %v4070_v26 }
0x1bef   :  { %v4083_v15 = vmax.f32 %v4081_v37, 0.0  ;;  %v4080_v61 = vsub.f32 %v4076_v13, %v4078_v27 }
0x1bf1   :  { %v4087_v38 = vadd.f32 1e-12, %v4083_v15  ;;  %v4082_v34 = vmax.f32 %v4080_v61, 0.0 }
0x1bf3   :  { %5100 = vrsqrt.f32 %v4087_v38  ;;  %v4086_v19 = vadd.f32 1e-12, %v4082_v34 }
0x1bf5   :  { %5102 = vrsqrt.f32 %v4086_v19 }
0x1c00   :  { %v5101_v31 = vpop.eup %5100 }
0x1c01   :  { %v4091_v35 = vmul.f32 %v5101_v31, %v4085_v5 }
0x1c02   :  { %v5103_v42 = vpop.eup %5102 }
0x1c03   :  { %v4090_v40 = vmul.f32 %v5103_v42, %v4084_v36  ;;  %v4097_v44 = vmul.f32 %v4462_v39, %v4091_v35 }
0x1c05   :  { %v4096_v25 = vmul.f32 %v4462_v39, %v4090_v40  ;;  %v4103_v50 = vadd.f32 %v4463_v48, %v4097_v44 }
0x1c07   :  { %v4102_v59 = vadd.f32 %v4463_v48, %v4096_v25 }
0x1c09   :  { %4954 = vmatprep.mubr.msk.f32.mxu0 %vm187_vm2, %v4102_v59 }
0x1c0a   :  { %4955 = vmatmul.mubr.msk.f32.vlgmr.msra.gmra.mxu0 %vm187_vm2, %v4103_v50 }
0x1c0b   :  { %4958 = vmatpush3.msra.mxu0 %v4197_v49  ;;  %4965 = vmatprep.mubr.msk.f32.mxu0 %vm5158_vm4, %v5157_v29 }
0x1c0c   :  { %4959 = vmatprep.subr.mxu0 %v5157_v29 }
0x1c0d   :  { %4960 = vmatpush3.msra.mxu0 %v4196_v52 }
0x1c0e   :  { %4961 = vmatprep.subr.mxu0 %v5157_v29 }
0x1c0f   :  { %4962 = vmatpush3.msra.mxu0 %v4195_v58 }
0x1c10   :  { %4963 = vmatprep.subr.mxu0 %v5157_v29 }
0x1c11   :  { %4964 = vmatpush3.msra.mxu0 %v4194_v62 }
0x1c12   :  { %4966 = vmatmul.mubr.msk.f32.vlgmr.msra.gmra.mxu0 %vm350_vm3, %v4210_v2 }
0x1cca   :  { %v4956_v0 = vpop.f32.mrf.mxu0 }
0x1ccb   :  { %v4189_v9 = vadd.f32 %v4956_v0, %v4464_v4 }
0x1ccc   :  { %v4183_v33 = vpop.f32.mrf.mxu0 }
0x1ccd   :  { %4193 = vst [vmem:[%s5884_s4 + $0x8] sm:$0xff] %v4189_v9  ;;  %v4184_v16 = vadd.f32 %v4464_v4, %v4183_v33 }
0x1ccf   :  { %4192 = vst [vmem:[%s5884_s4] sm:$0xff] %v4184_v16 }
0x1cd2   :  { %v4279_v6 = vpop.f32.mrf.mxu0 }
0x1cd3   :  { %v4280_v14 = vadd.f32 %v4467_v47, %v4279_v6 }
0x1cd4   :  { %v4967_v51 = vpop.f32.mrf.mxu0 }
0x1cd5   :  { %v4283_v29 = vmax.f32 %v4280_v14, 0.0 }
0x1cd7   :  { %4977 = vmatmul.mubr.msk.f32.vlgmr.msra.gmra.mxu1 %vm350_vm3, %v4283_v29 }
0x1d97   :  { %v4357_v17 = vpop.f32.mrf.mxu1 }
0x1d98   :  { %v4358_v56 = vadd.f32 %v4469_v43, %v4357_v17 }
0x1d99   :  { %v4978_v21 = vpop.f32.mrf.mxu1 }
0x1d9a   :  { %4361 = vst [vmem:[%s5885_s5] sm:$0x3] %v4358_v56 }
0x1d9b   :  { %4370 = vsyncpa [#allocation3], 1 }
0x1d9c   :  { %4371 = vsyncpa [#allocation5], 1 }

</bundles_post_ra>
